<compile_context>
chip_gen: v7x
topology: tpu7x:2x2x1
jax: 0.10.0
libtpu: 0.0.40
codegen_flags: <defaults>
</compile_context>

<pallas_src>
import functools
import math

import jax
import jax.numpy as jnp
from jax import lax
from jax.experimental import pallas as pl
from jax.experimental.pallas import tpu as pltpu


def _layernorm(x, gamma, beta, eps=1e-5):
    # single-pass variance: mean(x^2) - mean(x)^2
    mean = jnp.mean(x, axis=-1, keepdims=True)
    var = jnp.mean(x * x, axis=-1, keepdims=True) - mean * mean
    inv = lax.rsqrt(var + eps)
    return (x - mean) * inv * gamma + beta


# contract the last axis of both operands (q @ k^T without materializing k^T)
_DN_LAST = (((1,), (1,)), ((), ()))


def encoder_layer_kernel(
    xq_ref,                                 # (1, tq, D) f32  query tile (residual / Q source)
    xbf_ref,                                # (1, S, D)  bf16 full sequence (KV projection input)
    wq_ref, bq_ref,                         # (D, D) bf16 (scale folded), (1, D) f32 (scaled)
    wkv_ref, bkv_ref,                       # (D, 2D) bf16, (1, 2D) f32   fused K|V
    wo_ref, bo_ref,                         # (D, D) bf16, (1, D) f32
    g1_ref, be1_ref,                        # (1, D) f32  norm1
    w1_ref, b1_ref,                         # (D, F) bf16, (1, F) f32  linear1
    w2_ref, b2_ref,                         # (F, D) bf16, (1, D) f32  linear2
    g2_ref, be2_ref,                        # (1, D) f32  norm2
    o_ref,                                  # (1, tq, D)  f32
    kv_scr,                                 # (S, 2D) bf16 VMEM: per-batch cached K|V
    attn_scr,                               # (tq, D) bf16 VMEM: head-output slab
    *, heads: int,
):
    D = xq_ref.shape[2]
    hd = D // heads

    # --- K|V projection, only when a new batch starts.  The query-tile axis is
    # "arbitrary" (sequential), so qi == 0 marks the first tile of each batch
    # on every TPU generation (incl. v7x megacore sharding over batch).
    @pl.when(pl.program_id(1) == 0)
    def _():
        kv = (jnp.dot(xbf_ref[0], wkv_ref[...],
                      preferred_element_type=jnp.float32) + bkv_ref[...])
        kv_scr[...] = kv.astype(jnp.bfloat16)

    xq = xq_ref[0]                                      # (tq, D) f32 residual source
    xq_bf = xq.astype(jnp.bfloat16)

    # Q for this tile only; 1/sqrt(hd) already folded into wq/bq.
    q_bf = (jnp.dot(xq_bf, wq_ref[...], preferred_element_type=jnp.float32)
            + bq_ref[...]).astype(jnp.bfloat16)         # (tq, D)

    # --- per-head scaled dot-product attention (heads is small, static loop) ---
    for h in range(heads):
        lo = h * hd
        qh = q_bf[:, lo:lo + hd]                        # (tq, hd)
        kh = kv_scr[:, lo:lo + hd]                      # (S, hd) bf16 (cached)
        vh = kv_scr[:, D + lo:D + lo + hd]              # (S, hd) bf16 (cached)

        s = lax.dot_general(qh, kh, _DN_LAST,
                            preferred_element_type=jnp.float32)     # (tq, S)
        s = s - jnp.max(s, axis=-1, keepdims=True)
        p = jnp.exp(s)
        inv = pl.reciprocal(jnp.sum(p, axis=-1, keepdims=True), approx=True)
        p = (p * inv).astype(jnp.bfloat16)

        head_out = jnp.dot(p, vh, preferred_element_type=jnp.float32)
        attn_scr[:, lo:lo + hd] = head_out.astype(jnp.bfloat16)

    # out-projection on the assembled (tq, D) slab (full-depth K=D contraction)
    attn = (jnp.dot(attn_scr[...], wo_ref[...],
                    preferred_element_type=jnp.float32) + bo_ref[...])

    # --- add & norm 1 (f32) ---
    x1 = _layernorm(xq + attn, g1_ref[...], be1_ref[...])

    # --- feed-forward (bf16 matmuls, f32 elementwise) ---
    ff = (jnp.dot(x1.astype(jnp.bfloat16), w1_ref[...],
                  preferred_element_type=jnp.float32) + b1_ref[...])
    ff = jnp.maximum(ff, 0.0)
    ff = (jnp.dot(ff.astype(jnp.bfloat16), w2_ref[...],
                  preferred_element_type=jnp.float32) + b2_ref[...])

    # --- add & norm 2 (f32) ---
    y = _layernorm(x1 + ff, g2_ref[...], be2_ref[...])
    o_ref[0] = y.astype(o_ref.dtype)


def _pick_tq(S):
    # largest query tile that divides S; cap 512 (fine on 128 MiB v5e/v6e,
    # still modest on v7x at these D/F -- sweep 256/512 when tuning a real size)
    for t in (512, 256, 128):
        if S > t and S % t == 0:
            return t
    return S


def _vmem_limit_bytes(S, D, F, tq):
    bf, f4 = 2, 4
    weights = (4 * D * D + 2 * D * F) * bf              # wq, wkv, wo, w1, w2 (single-buffered)
    vectors = (9 * D + 2 * F) * f4                      # biases + norm params (approx)
    x_blocks = 2 * S * D * bf + 2 * tq * D * f4         # bf16 full seq + f32 tile (double-buffered)
    out_blocks = 2 * tq * D * f4
    scratch = S * 2 * D * bf + tq * D * bf              # KV cache + head slab
    temps = (max(S * 2 * D * f4, tq * F * (f4 + bf))    # kv f32 temp vs ffn temps
             + tq * S * f4 + 4 * tq * D * f4)           # scores + layernorm temps
    est = weights + vectors + x_blocks + out_blocks + scratch + temps
    # 1.5x headroom for compiler-internal scratch; clamp to 56 MiB so it stays
    # inside v7x's 64 MiB physical VMEM (v5e/v6e have 128 MiB and can go higher).
    return int(min(max(1.5 * est + (2 << 20), 16 << 20), 56 << 20))


def _cost_estimate(B, S, D, F, heads):
    flops = 2 * B * (S * D * D            # Q projection
                     + S * D * 2 * D      # K|V projection
                     + 2 * S * S * D      # scores + attn @ V
                     + S * D * D          # out projection
                     + 2 * S * D * F)     # feed-forward
    transcendentals = B * heads * S * S + 6 * B * S     # exp + rsqrt/reciprocal
    weight_bytes = (4 * D * D + 2 * D * F) * 2 + (9 * D + 2 * F) * 4
    bytes_accessed = B * S * D * (4 + 2 + 4) + weight_bytes
    return pl.CostEstimate(flops=flops, transcendentals=transcendentals,
                           bytes_accessed=bytes_accessed)


def transformer_block(x, params, heads):
    B, S, D = x.shape
    F = params["w1"].shape[1]
    tq = _pick_tq(S)
    nq = S // tq

    x_bf = x.astype(jnp.bfloat16)    # matmul-path copy (halves full-seq x DMA)

    def const_spec(shape):
        # constant index map -> DMA'd once; single-buffered (no wasted 2nd buffer)
        n = len(shape)
        return pl.BlockSpec(shape, lambda b, q: (0,) * n,
                            pipeline_mode=pl.Buffered(1))

    in_specs = [
        pl.BlockSpec((1, tq, D), lambda b, q: (b, q, 0)),   # x f32 query tile
        pl.BlockSpec((1, S, D), lambda b, q: (b, 0, 0)),    # x bf16 full seq (per-batch DMA)
        const_spec((D, D)), const_spec((1, D)),             # wq (scaled), bq (scaled)
        const_spec((D, 2 * D)), const_spec((1, 2 * D)),     # wkv, bkv
        const_spec((D, D)), const_spec((1, D)),             # wo, bo
        const_spec((1, D)), const_spec((1, D)),             # gamma1, beta1
        const_spec((D, F)), const_spec((1, F)),             # w1, b1
        const_spec((F, D)), const_spec((1, D)),             # w2, b2
        const_spec((1, D)), const_spec((1, D)),             # gamma2, beta2
    ]
    out_spec = pl.BlockSpec((1, tq, D), lambda b, q: (b, q, 0))

    kernel = functools.partial(encoder_layer_kernel, heads=heads)

    return pl.pallas_call(
        kernel,
        out_shape=jax.ShapeDtypeStruct((B, S, D), x.dtype),
        grid_spec=pltpu.PrefetchScalarGridSpec(
            num_scalar_prefetch=0,
            grid=(B, nq),
            in_specs=in_specs,
            out_specs=out_spec,
            scratch_shapes=[
                pltpu.VMEM((S, 2 * D), jnp.bfloat16),   # per-batch K|V cache
                pltpu.VMEM((tq, D), jnp.bfloat16),      # head-output slab
            ],
        ),
        compiler_params=pltpu.CompilerParams(
            # batch = megacore-parallel axis; query tiles sequential so the
            # per-batch KV cache (qi == 0 guard) stays valid on v7x.
            dimension_semantics=("parallel", "arbitrary"),
            vmem_limit_bytes=_vmem_limit_bytes(S, D, F, tq),
        ),
        cost_estimate=_cost_estimate(B, S, D, F, heads),
    )(
        x, x_bf,
        params["wq"], params["bq"],
        params["wkv"], params["bkv"],
        params["wo"], params["bo"],
        params["g1"], params["beta1"],
        params["w1"], params["b1"],
        params["w2"], params["b2"],
        params["g2"], params["beta2"],
    )


def init_params(key, size, heads, dim_feedforward=2048):
    D, F = size, dim_feedforward
    hd = D // heads
    scale = 1.0 / math.sqrt(hd)
    ks = jax.random.split(key, 6)
    std = 0.02

    # PyTorch stores in_proj_weight (3D, D), out_proj (D, D), linear1 (F, D),
    # linear2 (D, F).  We pre-transpose so the kernel does x @ W^T, fold the
    # 1/sqrt(hd) scale into the Q weights/bias, fuse K|V column-wise, and store
    # all matmul weights in bf16 (biases / norm params stay f32).
    wq = jax.random.normal(ks[0], (D, D), jnp.float32) * std
    wk = jax.random.normal(ks[1], (D, D), jnp.float32) * std
    wv = jax.random.normal(ks[2], (D, D), jnp.float32) * std
    wo = jax.random.normal(ks[3], (D, D), jnp.float32) * std
    w1 = jax.random.normal(ks[4], (F, D), jnp.float32) * std
    w2 = jax.random.normal(ks[5], (D, F), jnp.float32) * std

    bq = jnp.zeros((1, D), jnp.float32)
    bk = jnp.zeros((1, D), jnp.float32)
    bv = jnp.zeros((1, D), jnp.float32)

    return {
        "wq": (wq.T * scale).astype(jnp.bfloat16),
        "bq": bq * scale,
        "wkv": jnp.concatenate([wk.T, wv.T], axis=1).astype(jnp.bfloat16),
        "bkv": jnp.concatenate([bk, bv], axis=1),
        "wo": wo.T.astype(jnp.bfloat16),
        "bo": jnp.zeros((1, D), jnp.float32),
        "g1": jnp.ones((1, D), jnp.float32),
        "beta1": jnp.zeros((1, D), jnp.float32),
        "w1": w1.T.astype(jnp.bfloat16),
        "b1": jnp.zeros((1, F), jnp.float32),
        "w2": w2.T.astype(jnp.bfloat16),
        "b2": jnp.zeros((1, D), jnp.float32),
        "g2": jnp.ones((1, D), jnp.float32),
        "beta2": jnp.zeros((1, D), jnp.float32),
    }


if __name__ == "__main__":
    B, S, D, H = 2, 8, 32, 4          # batch, seq, d_model, heads (small test shapes)
    key = jax.random.PRNGKey(0)
    kx, kp = jax.random.split(key)

    x = jax.random.normal(kx, (B, S, D), jnp.float32)
    params = init_params(kp, D, H)

    y = transformer_block(x, params, heads=H)
    jax.block_until_ready(y)

    assert y.shape == (B, S, D) and y.dtype == jnp.float32
    assert bool(jnp.all(jnp.isfinite(y)))
    print("KERNEL_OK")
</pallas_src>

<mosaic_0001>
module attributes {stable_mosaic.version = 11 : i64} {
  func.func @encoder_layer_kernel(%arg0: i32, %arg1: i32, %arg2: memref<1x8x32xf32, #tpu.memory_space<vmem>>, %arg3: memref<1x8x32xbf16, #tpu.memory_space<vmem>>, %arg4: memref<32x32xbf16, #tpu.memory_space<vmem>>, %arg5: memref<1x32xf32, #tpu.memory_space<vmem>>, %arg6: memref<32x64xbf16, #tpu.memory_space<vmem>>, %arg7: memref<1x64xf32, #tpu.memory_space<vmem>>, %arg8: memref<32x32xbf16, #tpu.memory_space<vmem>>, %arg9: memref<1x32xf32, #tpu.memory_space<vmem>>, %arg10: memref<1x32xf32, #tpu.memory_space<vmem>>, %arg11: memref<1x32xf32, #tpu.memory_space<vmem>>, %arg12: memref<32x2048xbf16, #tpu.memory_space<vmem>>, %arg13: memref<1x2048xf32, #tpu.memory_space<vmem>>, %arg14: memref<2048x32xbf16, #tpu.memory_space<vmem>>, %arg15: memref<1x32xf32, #tpu.memory_space<vmem>>, %arg16: memref<1x32xf32, #tpu.memory_space<vmem>>, %arg17: memref<1x32xf32, #tpu.memory_space<vmem>>, %arg18: memref<1x8x32xf32, #tpu.memory_space<vmem>>, %arg19: memref<8x64xbf16, #tpu.memory_space<vmem>>, %arg20: memref<8x32xbf16, #tpu.memory_space<vmem>>) attributes {dimension_semantics = [#tpu.dimension_semantics<parallel>, #tpu.dimension_semantics<arbitrary>], iteration_bounds = array<i64: 2, 1>, scalar_prefetch = 0 : i64, scratch_operands = 2 : i64, tpu.core_type = #tpu.core_type<tc>, window_params = [{transform_indices = @transform_0, window_bounds = array<i64: 1, 8, 32>}, {transform_indices = @transform_1, window_bounds = array<i64: 1, 8, 32>}, {pipeline_mode = #tpu.pipeline_mode<synchronous>, transform_indices = @transform_2, window_bounds = array<i64: 32, 32>}, {pipeline_mode = #tpu.pipeline_mode<synchronous>, transform_indices = @transform_3, window_bounds = array<i64: 1, 32>}, {pipeline_mode = #tpu.pipeline_mode<synchronous>, transform_indices = @transform_4, window_bounds = array<i64: 32, 64>}, {pipeline_mode = #tpu.pipeline_mode<synchronous>, transform_indices = @transform_5, window_bounds = array<i64: 1, 64>}, {pipeline_mode = #tpu.pipeline_mode<synchronous>, transform_indices = @transform_6, window_bounds = array<i64: 32, 32>}, {pipeline_mode = #tpu.pipeline_mode<synchronous>, transform_indices = @transform_7, window_bounds = array<i64: 1, 32>}, {pipeline_mode = #tpu.pipeline_mode<synchronous>, transform_indices = @transform_8, window_bounds = array<i64: 1, 32>}, {pipeline_mode = #tpu.pipeline_mode<synchronous>, transform_indices = @transform_9, window_bounds = array<i64: 1, 32>}, {pipeline_mode = #tpu.pipeline_mode<synchronous>, transform_indices = @transform_10, window_bounds = array<i64: 32, 2048>}, {pipeline_mode = #tpu.pipeline_mode<synchronous>, transform_indices = @transform_11, window_bounds = array<i64: 1, 2048>}, {pipeline_mode = #tpu.pipeline_mode<synchronous>, transform_indices = @transform_12, window_bounds = array<i64: 2048, 32>}, {pipeline_mode = #tpu.pipeline_mode<synchronous>, transform_indices = @transform_13, window_bounds = array<i64: 1, 32>}, {pipeline_mode = #tpu.pipeline_mode<synchronous>, transform_indices = @transform_14, window_bounds = array<i64: 1, 32>}, {pipeline_mode = #tpu.pipeline_mode<synchronous>, transform_indices = @transform_15, window_bounds = array<i64: 1, 32>}, {transform_indices = @transform_16, window_bounds = array<i64: 1, 8, 32>}]} {
    %c0_i32 = arith.constant 0 : i32
    %0 = arith.cmpi eq, %arg1, %c0_i32 : i32
    %1 = arith.extui %0 : i1 to i32
    %c0_i32_0 = arith.constant 0 : i32
    %2 = arith.cmpi ne, %1, %c0_i32_0 : i32
    scf.if %2 {
      %c0_79 = arith.constant 0 : index
      %c0_80 = arith.constant 0 : index
      %c0_81 = arith.constant 0 : index
      %157 = vector.load %arg3[%c0_79, %c0_80, %c0_81] : memref<1x8x32xbf16, #tpu.memory_space<vmem>>, vector<1x8x32xbf16>
      %158 = vector.shape_cast %157 : vector<1x8x32xbf16> to vector<8x32xbf16>
      %c0_82 = arith.constant 0 : index
      %c0_83 = arith.constant 0 : index
      %159 = vector.load %arg6[%c0_82, %c0_83] : memref<32x64xbf16, #tpu.memory_space<vmem>>, vector<32x64xbf16>
      %cst_84 = arith.constant dense<0.000000e+00> : vector<8x64xf32>
      %160 = tpu.matmul %158, %159, %cst_84 {dimension_numbers = #tpu.dot_dimension_numbers<[1], [0], [0], [1], [0, 0, 1, 1], [], []>} : vector<8x32xbf16>, vector<32x64xbf16>, vector<8x64xf32> -> vector<8x64xf32>
      %c0_85 = arith.constant 0 : index
      %c0_86 = arith.constant 0 : index
      %161 = vector.load %arg7[%c0_85, %c0_86] : memref<1x64xf32, #tpu.memory_space<vmem>>, vector<1x64xf32>
      %162 = vector.broadcast %161 : vector<1x64xf32> to vector<8x64xf32>
      %163 = arith.addf %160, %162 : vector<8x64xf32>
      %164 = arith.truncf %163 : vector<8x64xf32> to vector<8x64xbf16>
      %c0_87 = arith.constant 0 : index
      %c0_88 = arith.constant 0 : index
      %165 = vector.load %arg19[%c0_87, %c0_88] : memref<8x64xbf16, #tpu.memory_space<vmem>>, vector<8x64xbf16>
      tpu.vector_store %arg19[%c0_87, %c0_88], %164 {strides = array<i32>} : memref<8x64xbf16, #tpu.memory_space<vmem>>, vector<8x64xbf16>,
    } else {
    }
    %c0 = arith.constant 0 : index
    %c0_1 = arith.constant 0 : index
    %c0_2 = arith.constant 0 : index
    %3 = vector.load %arg2[%c0, %c0_1, %c0_2] : memref<1x8x32xf32, #tpu.memory_space<vmem>>, vector<1x8x32xf32>
    %4 = vector.shape_cast %3 : vector<1x8x32xf32> to vector<8x32xf32>
    %5 = arith.truncf %4 : vector<8x32xf32> to vector<8x32xbf16>
    %c0_3 = arith.constant 0 : index
    %c0_4 = arith.constant 0 : index
    %6 = vector.load %arg4[%c0_3, %c0_4] : memref<32x32xbf16, #tpu.memory_space<vmem>>, vector<32x32xbf16>
    %cst = arith.constant dense<0.000000e+00> : vector<8x32xf32>
    %7 = tpu.matmul %5, %6, %cst {dimension_numbers = #tpu.dot_dimension_numbers<[1], [0], [0], [1], [0, 0, 1, 1], [], []>} : vector<8x32xbf16>, vector<32x32xbf16>, vector<8x32xf32> -> vector<8x32xf32>
    %c0_5 = arith.constant 0 : index
    %c0_6 = arith.constant 0 : index
    %8 = vector.load %arg5[%c0_5, %c0_6] : memref<1x32xf32, #tpu.memory_space<vmem>>, vector<1x32xf32>
    %9 = vector.broadcast %8 : vector<1x32xf32> to vector<8x32xf32>
    %10 = arith.addf %7, %9 : vector<8x32xf32>
    %11 = arith.truncf %10 : vector<8x32xf32> to vector<8x32xbf16>
    %12 = vector.extract_strided_slice %11 {offsets = [0, 0], sizes = [8, 8], strides = [1, 1]} : vector<8x32xbf16> to vector<8x8xbf16>
    %c0_7 = arith.constant 0 : index
    %c0_8 = arith.constant 0 : index
    %13 = vector.load %arg19[%c0_7, %c0_8] : memref<8x64xbf16, #tpu.memory_space<vmem>>, vector<8x8xbf16>
    %c0_9 = arith.constant 0 : index
    %c32 = arith.constant 32 : index
    %14 = vector.load %arg19[%c0_9, %c32] : memref<8x64xbf16, #tpu.memory_space<vmem>>, vector<8x8xbf16>
    %cst_10 = arith.constant dense<0.000000e+00> : vector<8x8xf32>
    %15 = tpu.matmul %12, %13, %cst_10 {dimension_numbers = #tpu.dot_dimension_numbers<[1], [1], [0], [0], [0, 0, 1, 0], [], []>} : vector<8x8xbf16>, vector<8x8xbf16>, vector<8x8xf32> -> vector<8x8xf32>
    %cst_11 = arith.constant dense<0xFF800000> : vector<8xf32>
    %16 = vector.multi_reduction <maximumf>, %15, %cst_11 [1] : vector<8x8xf32> to vector<8xf32>
    %17 = vector.shape_cast %16 : vector<8xf32> to vector<8x1xf32>
    %18 = vector.broadcast %17 : vector<8x1xf32> to vector<8x8xf32>
    %19 = arith.subf %15, %18 : vector<8x8xf32>
    %20 = math.exp %19 : vector<8x8xf32>
    %cst_12 = arith.constant dense<0.000000e+00> : vector<8xf32>
    %21 = vector.multi_reduction <add>, %20, %cst_12 [1] : vector<8x8xf32> to vector<8xf32>
    %22 = vector.shape_cast %21 : vector<8xf32> to vector<8x1xf32>
    %23 = tpu.reciprocal %22 {approx = true} : vector<8x1xf32> -> vector<8x1xf32>
    %24 = vector.broadcast %23 : vector<8x1xf32> to vector<8x8xf32>
    %25 = arith.mulf %20, %24 : vector<8x8xf32>
    %26 = arith.truncf %25 : vector<8x8xf32> to vector<8x8xbf16>
    %cst_13 = arith.constant dense<0.000000e+00> : vector<8x8xf32>
    %27 = tpu.matmul %26, %14, %cst_13 {dimension_numbers = #tpu.dot_dimension_numbers<[1], [0], [0], [1], [0, 0, 1, 1], [], []>} : vector<8x8xbf16>, vector<8x8xbf16>, vector<8x8xf32> -> vector<8x8xf32>
    %28 = arith.truncf %27 : vector<8x8xf32> to vector<8x8xbf16>
    %c0_14 = arith.constant 0 : index
    %c0_15 = arith.constant 0 : index
    %29 = vector.load %arg20[%c0_14, %c0_15] : memref<8x32xbf16, #tpu.memory_space<vmem>>, vector<8x8xbf16>
    tpu.vector_store %arg20[%c0_14, %c0_15], %28 {strides = array<i32>} : memref<8x32xbf16, #tpu.memory_space<vmem>>, vector<8x8xbf16>,
    %30 = vector.extract_strided_slice %11 {offsets = [0, 8], sizes = [8, 8], strides = [1, 1]} : vector<8x32xbf16> to vector<8x8xbf16>
    %c0_16 = arith.constant 0 : index
    %c8 = arith.constant 8 : index
    %31 = vector.load %arg19[%c0_16, %c8] : memref<8x64xbf16, #tpu.memory_space<vmem>>, vector<8x8xbf16>
    %c0_17 = arith.constant 0 : index
    %c40 = arith.constant 40 : index
    %32 = vector.load %arg19[%c0_17, %c40] : memref<8x64xbf16, #tpu.memory_space<vmem>>, vector<8x8xbf16>
    %cst_18 = arith.constant dense<0.000000e+00> : vector<8x8xf32>
    %33 = tpu.matmul %30, %31, %cst_18 {dimension_numbers = #tpu.dot_dimension_numbers<[1], [1], [0], [0], [0, 0, 1, 0], [], []>} : vector<8x8xbf16>, vector<8x8xbf16>, vector<8x8xf32> -> vector<8x8xf32>
    %cst_19 = arith.constant dense<0xFF800000> : vector<8xf32>
    %34 = vector.multi_reduction <maximumf>, %33, %cst_19 [1] : vector<8x8xf32> to vector<8xf32>
    %35 = vector.shape_cast %34 : vector<8xf32> to vector<8x1xf32>
    %36 = vector.broadcast %35 : vector<8x1xf32> to vector<8x8xf32>
    %37 = arith.subf %33, %36 : vector<8x8xf32>
    %38 = math.exp %37 : vector<8x8xf32>
    %cst_20 = arith.constant dense<0.000000e+00> : vector<8xf32>
    %39 = vector.multi_reduction <add>, %38, %cst_20 [1] : vector<8x8xf32> to vector<8xf32>
    %40 = vector.shape_cast %39 : vector<8xf32> to vector<8x1xf32>
    %41 = tpu.reciprocal %40 {approx = true} : vector<8x1xf32> -> vector<8x1xf32>
    %42 = vector.broadcast %41 : vector<8x1xf32> to vector<8x8xf32>
    %43 = arith.mulf %38, %42 : vector<8x8xf32>
    %44 = arith.truncf %43 : vector<8x8xf32> to vector<8x8xbf16>
    %cst_21 = arith.constant dense<0.000000e+00> : vector<8x8xf32>
    %45 = tpu.matmul %44, %32, %cst_21 {dimension_numbers = #tpu.dot_dimension_numbers<[1], [0], [0], [1], [0, 0, 1, 1], [], []>} : vector<8x8xbf16>, vector<8x8xbf16>, vector<8x8xf32> -> vector<8x8xf32>
    %46 = arith.truncf %45 : vector<8x8xf32> to vector<8x8xbf16>
    %c0_22 = arith.constant 0 : index
    %c8_23 = arith.constant 8 : index
    %47 = vector.load %arg20[%c0_22, %c8_23] : memref<8x32xbf16, #tpu.memory_space<vmem>>, vector<8x8xbf16>
    tpu.vector_store %arg20[%c0_22, %c8_23], %46 {strides = array<i32>} : memref<8x32xbf16, #tpu.memory_space<vmem>>, vector<8x8xbf16>,
    %48 = vector.extract_strided_slice %11 {offsets = [0, 16], sizes = [8, 8], strides = [1, 1]} : vector<8x32xbf16> to vector<8x8xbf16>
    %c0_24 = arith.constant 0 : index
    %c16 = arith.constant 16 : index
    %49 = vector.load %arg19[%c0_24, %c16] : memref<8x64xbf16, #tpu.memory_space<vmem>>, vector<8x8xbf16>
    %c0_25 = arith.constant 0 : index
    %c48 = arith.constant 48 : index
    %50 = vector.load %arg19[%c0_25, %c48] : memref<8x64xbf16, #tpu.memory_space<vmem>>, vector<8x8xbf16>
    %cst_26 = arith.constant dense<0.000000e+00> : vector<8x8xf32>
    %51 = tpu.matmul %48, %49, %cst_26 {dimension_numbers = #tpu.dot_dimension_numbers<[1], [1], [0], [0], [0, 0, 1, 0], [], []>} : vector<8x8xbf16>, vector<8x8xbf16>, vector<8x8xf32> -> vector<8x8xf32>
    %cst_27 = arith.constant dense<0xFF800000> : vector<8xf32>
    %52 = vector.multi_reduction <maximumf>, %51, %cst_27 [1] : vector<8x8xf32> to vector<8xf32>
    %53 = vector.shape_cast %52 : vector<8xf32> to vector<8x1xf32>
    %54 = vector.broadcast %53 : vector<8x1xf32> to vector<8x8xf32>
    %55 = arith.subf %51, %54 : vector<8x8xf32>
    %56 = math.exp %55 : vector<8x8xf32>
    %cst_28 = arith.constant dense<0.000000e+00> : vector<8xf32>
    %57 = vector.multi_reduction <add>, %56, %cst_28 [1] : vector<8x8xf32> to vector<8xf32>
    %58 = vector.shape_cast %57 : vector<8xf32> to vector<8x1xf32>
    %59 = tpu.reciprocal %58 {approx = true} : vector<8x1xf32> -> vector<8x1xf32>
    %60 = vector.broadcast %59 : vector<8x1xf32> to vector<8x8xf32>
    %61 = arith.mulf %56, %60 : vector<8x8xf32>
    %62 = arith.truncf %61 : vector<8x8xf32> to vector<8x8xbf16>
    %cst_29 = arith.constant dense<0.000000e+00> : vector<8x8xf32>
    %63 = tpu.matmul %62, %50, %cst_29 {dimension_numbers = #tpu.dot_dimension_numbers<[1], [0], [0], [1], [0, 0, 1, 1], [], []>} : vector<8x8xbf16>, vector<8x8xbf16>, vector<8x8xf32> -> vector<8x8xf32>
    %64 = arith.truncf %63 : vector<8x8xf32> to vector<8x8xbf16>
    %c0_30 = arith.constant 0 : index
    %c16_31 = arith.constant 16 : index
    %65 = vector.load %arg20[%c0_30, %c16_31] : memref<8x32xbf16, #tpu.memory_space<vmem>>, vector<8x8xbf16>
    tpu.vector_store %arg20[%c0_30, %c16_31], %64 {strides = array<i32>} : memref<8x32xbf16, #tpu.memory_space<vmem>>, vector<8x8xbf16>,
    %66 = vector.extract_strided_slice %11 {offsets = [0, 24], sizes = [8, 8], strides = [1, 1]} : vector<8x32xbf16> to vector<8x8xbf16>
    %c0_32 = arith.constant 0 : index
    %c24 = arith.constant 24 : index
    %67 = vector.load %arg19[%c0_32, %c24] : memref<8x64xbf16, #tpu.memory_space<vmem>>, vector<8x8xbf16>
    %c0_33 = arith.constant 0 : index
    %c56 = arith.constant 56 : index
    %68 = vector.load %arg19[%c0_33, %c56] : memref<8x64xbf16, #tpu.memory_space<vmem>>, vector<8x8xbf16>
    %cst_34 = arith.constant dense<0.000000e+00> : vector<8x8xf32>
    %69 = tpu.matmul %66, %67, %cst_34 {dimension_numbers = #tpu.dot_dimension_numbers<[1], [1], [0], [0], [0, 0, 1, 0], [], []>} : vector<8x8xbf16>, vector<8x8xbf16>, vector<8x8xf32> -> vector<8x8xf32>
    %cst_35 = arith.constant dense<0xFF800000> : vector<8xf32>
    %70 = vector.multi_reduction <maximumf>, %69, %cst_35 [1] : vector<8x8xf32> to vector<8xf32>
    %71 = vector.shape_cast %70 : vector<8xf32> to vector<8x1xf32>
    %72 = vector.broadcast %71 : vector<8x1xf32> to vector<8x8xf32>
    %73 = arith.subf %69, %72 : vector<8x8xf32>
    %74 = math.exp %73 : vector<8x8xf32>
    %cst_36 = arith.constant dense<0.000000e+00> : vector<8xf32>
    %75 = vector.multi_reduction <add>, %74, %cst_36 [1] : vector<8x8xf32> to vector<8xf32>
    %76 = vector.shape_cast %75 : vector<8xf32> to vector<8x1xf32>
    %77 = tpu.reciprocal %76 {approx = true} : vector<8x1xf32> -> vector<8x1xf32>
    %78 = vector.broadcast %77 : vector<8x1xf32> to vector<8x8xf32>
    %79 = arith.mulf %74, %78 : vector<8x8xf32>
    %80 = arith.truncf %79 : vector<8x8xf32> to vector<8x8xbf16>
    %cst_37 = arith.constant dense<0.000000e+00> : vector<8x8xf32>
    %81 = tpu.matmul %80, %68, %cst_37 {dimension_numbers = #tpu.dot_dimension_numbers<[1], [0], [0], [1], [0, 0, 1, 1], [], []>} : vector<8x8xbf16>, vector<8x8xbf16>, vector<8x8xf32> -> vector<8x8xf32>
    %82 = arith.truncf %81 : vector<8x8xf32> to vector<8x8xbf16>
    %c0_38 = arith.constant 0 : index
    %c24_39 = arith.constant 24 : index
    %83 = vector.load %arg20[%c0_38, %c24_39] : memref<8x32xbf16, #tpu.memory_space<vmem>>, vector<8x8xbf16>
    tpu.vector_store %arg20[%c0_38, %c24_39], %82 {strides = array<i32>} : memref<8x32xbf16, #tpu.memory_space<vmem>>, vector<8x8xbf16>,
    %c0_40 = arith.constant 0 : index
    %c0_41 = arith.constant 0 : index
    %84 = vector.load %arg20[%c0_40, %c0_41] : memref<8x32xbf16, #tpu.memory_space<vmem>>, vector<8x32xbf16>
    %c0_42 = arith.constant 0 : index
    %c0_43 = arith.constant 0 : index
    %85 = vector.load %arg8[%c0_42, %c0_43] : memref<32x32xbf16, #tpu.memory_space<vmem>>, vector<32x32xbf16>
    %cst_44 = arith.constant dense<0.000000e+00> : vector<8x32xf32>
    %86 = tpu.matmul %84, %85, %cst_44 {dimension_numbers = #tpu.dot_dimension_numbers<[1], [0], [0], [1], [0, 0, 1, 1], [], []>} : vector<8x32xbf16>, vector<32x32xbf16>, vector<8x32xf32> -> vector<8x32xf32>
    %c0_45 = arith.constant 0 : index
    %c0_46 = arith.constant 0 : index
    %87 = vector.load %arg9[%c0_45, %c0_46] : memref<1x32xf32, #tpu.memory_space<vmem>>, vector<1x32xf32>
    %88 = vector.broadcast %87 : vector<1x32xf32> to vector<8x32xf32>
    %89 = arith.addf %86, %88 : vector<8x32xf32>
    %90 = arith.addf %4, %89 : vector<8x32xf32>
    %c0_47 = arith.constant 0 : index
    %c0_48 = arith.constant 0 : index
    %91 = vector.load %arg10[%c0_47, %c0_48] : memref<1x32xf32, #tpu.memory_space<vmem>>, vector<1x32xf32>
    %c0_49 = arith.constant 0 : index
    %c0_50 = arith.constant 0 : index
    %92 = vector.load %arg11[%c0_49, %c0_50] : memref<1x32xf32, #tpu.memory_space<vmem>>, vector<1x32xf32>
    %cst_51 = arith.constant dense<0.000000e+00> : vector<8xf32>
    %93 = vector.multi_reduction <add>, %90, %cst_51 [1] : vector<8x32xf32> to vector<8xf32>
    %94 = vector.shape_cast %93 : vector<8xf32> to vector<8x1xf32>
    %cst_52 = arith.constant 3.200000e+01 : f32
    %95 = vector.broadcast %cst_52 : f32 to vector<8x1xf32>
    %96 = arith.divf %94, %95 : vector<8x1xf32>
    %97 = arith.mulf %90, %90 : vector<8x32xf32>
    %cst_53 = arith.constant dense<0.000000e+00> : vector<8xf32>
    %98 = vector.multi_reduction <add>, %97, %cst_53 [1] : vector<8x32xf32> to vector<8xf32>
    %99 = vector.shape_cast %98 : vector<8xf32> to vector<8x1xf32>
    %cst_54 = arith.constant 3.200000e+01 : f32
    %100 = vector.broadcast %cst_54 : f32 to vector<8x1xf32>
    %101 = arith.divf %99, %100 : vector<8x1xf32>
    %102 = arith.mulf %96, %96 : vector<8x1xf32>
    %103 = arith.subf %101, %102 : vector<8x1xf32>
    %cst_55 = arith.constant 9.99999974E-6 : f32
    %104 = vector.broadcast %cst_55 : f32 to vector<8x1xf32>
    %105 = arith.addf %103, %104 : vector<8x1xf32>
    %106 = math.rsqrt %105 : vector<8x1xf32>
    %107 = vector.broadcast %96 : vector<8x1xf32> to vector<8x32xf32>
    %108 = arith.subf %90, %107 : vector<8x32xf32>
    %109 = vector.broadcast %106 : vector<8x1xf32> to vector<8x32xf32>
    %110 = arith.mulf %108, %109 : vector<8x32xf32>
    %111 = vector.broadcast %91 : vector<1x32xf32> to vector<8x32xf32>
    %112 = arith.mulf %110, %111 : vector<8x32xf32>
    %113 = vector.broadcast %92 : vector<1x32xf32> to vector<8x32xf32>
    %114 = arith.addf %112, %113 : vector<8x32xf32>
    %115 = arith.truncf %114 : vector<8x32xf32> to vector<8x32xbf16>
    %c0_56 = arith.constant 0 : index
    %c0_57 = arith.constant 0 : index
    %116 = vector.load %arg12[%c0_56, %c0_57] : memref<32x2048xbf16, #tpu.memory_space<vmem>>, vector<32x2048xbf16>
    %cst_58 = arith.constant dense<0.000000e+00> : vector<8x2048xf32>
    %117 = tpu.matmul %115, %116, %cst_58 {dimension_numbers = #tpu.dot_dimension_numbers<[1], [0], [0], [1], [0, 0, 1, 1], [], []>} : vector<8x32xbf16>, vector<32x2048xbf16>, vector<8x2048xf32> -> vector<8x2048xf32>
    %c0_59 = arith.constant 0 : index
    %c0_60 = arith.constant 0 : index
    %118 = vector.load %arg13[%c0_59, %c0_60] : memref<1x2048xf32, #tpu.memory_space<vmem>>, vector<1x2048xf32>
    %119 = vector.broadcast %118 : vector<1x2048xf32> to vector<8x2048xf32>
    %120 = arith.addf %117, %119 : vector<8x2048xf32>
    %cst_61 = arith.constant 0.000000e+00 : f32
    %121 = vector.broadcast %cst_61 : f32 to vector<8x2048xf32>
    %122 = arith.maximumf %120, %121 : vector<8x2048xf32>
    %123 = arith.truncf %122 : vector<8x2048xf32> to vector<8x2048xbf16>
    %c0_62 = arith.constant 0 : index
    %c0_63 = arith.constant 0 : index
    %124 = vector.load %arg14[%c0_62, %c0_63] : memref<2048x32xbf16, #tpu.memory_space<vmem>>, vector<2048x32xbf16>
    %cst_64 = arith.constant dense<0.000000e+00> : vector<8x32xf32>
    %125 = tpu.matmul %123, %124, %cst_64 {dimension_numbers = #tpu.dot_dimension_numbers<[1], [0], [0], [1], [0, 0, 1, 1], [], []>} : vector<8x2048xbf16>, vector<2048x32xbf16>, vector<8x32xf32> -> vector<8x32xf32>
    %c0_65 = arith.constant 0 : index
    %c0_66 = arith.constant 0 : index
    %126 = vector.load %arg15[%c0_65, %c0_66] : memref<1x32xf32, #tpu.memory_space<vmem>>, vector<1x32xf32>
    %127 = vector.broadcast %126 : vector<1x32xf32> to vector<8x32xf32>
    %128 = arith.addf %125, %127 : vector<8x32xf32>
    %129 = arith.addf %114, %128 : vector<8x32xf32>
    %c0_67 = arith.constant 0 : index
    %c0_68 = arith.constant 0 : index
    %130 = vector.load %arg16[%c0_67, %c0_68] : memref<1x32xf32, #tpu.memory_space<vmem>>, vector<1x32xf32>
    %c0_69 = arith.constant 0 : index
    %c0_70 = arith.constant 0 : index
    %131 = vector.load %arg17[%c0_69, %c0_70] : memref<1x32xf32, #tpu.memory_space<vmem>>, vector<1x32xf32>
    %cst_71 = arith.constant dense<0.000000e+00> : vector<8xf32>
    %132 = vector.multi_reduction <add>, %129, %cst_71 [1] : vector<8x32xf32> to vector<8xf32>
    %133 = vector.shape_cast %132 : vector<8xf32> to vector<8x1xf32>
    %cst_72 = arith.constant 3.200000e+01 : f32
    %134 = vector.broadcast %cst_72 : f32 to vector<8x1xf32>
    %135 = arith.divf %133, %134 : vector<8x1xf32>
    %136 = arith.mulf %129, %129 : vector<8x32xf32>
    %cst_73 = arith.constant dense<0.000000e+00> : vector<8xf32>
    %137 = vector.multi_reduction <add>, %136, %cst_73 [1] : vector<8x32xf32> to vector<8xf32>
    %138 = vector.shape_cast %137 : vector<8xf32> to vector<8x1xf32>
    %cst_74 = arith.constant 3.200000e+01 : f32
    %139 = vector.broadcast %cst_74 : f32 to vector<8x1xf32>
    %140 = arith.divf %138, %139 : vector<8x1xf32>
    %141 = arith.mulf %135, %135 : vector<8x1xf32>
    %142 = arith.subf %140, %141 : vector<8x1xf32>
    %cst_75 = arith.constant 9.99999974E-6 : f32
    %143 = vector.broadcast %cst_75 : f32 to vector<8x1xf32>
    %144 = arith.addf %142, %143 : vector<8x1xf32>
    %145 = math.rsqrt %144 : vector<8x1xf32>
    %146 = vector.broadcast %135 : vector<8x1xf32> to vector<8x32xf32>
    %147 = arith.subf %129, %146 : vector<8x32xf32>
    %148 = vector.broadcast %145 : vector<8x1xf32> to vector<8x32xf32>
    %149 = arith.mulf %147, %148 : vector<8x32xf32>
    %150 = vector.broadcast %130 : vector<1x32xf32> to vector<8x32xf32>
    %151 = arith.mulf %149, %150 : vector<8x32xf32>
    %152 = vector.broadcast %131 : vector<1x32xf32> to vector<8x32xf32>
    %153 = arith.addf %151, %152 : vector<8x32xf32>
    %c0_76 = arith.constant 0 : index
    %c0_77 = arith.constant 0 : index
    %c0_78 = arith.constant 0 : index
    %154 = vector.load %arg18[%c0_76, %c0_77, %c0_78] : memref<1x8x32xf32, #tpu.memory_space<vmem>>, vector<1x8x32xf32>
    %155 = vector.shape_cast %154 : vector<1x8x32xf32> to vector<8x32xf32>
    %156 = vector.shape_cast %153 : vector<8x32xf32> to vector<1x8x32xf32>
    tpu.vector_store %arg18[%c0_76, %c0_77, %c0_78], %156 {strides = array<i32>} : memref<1x8x32xf32, #tpu.memory_space<vmem>>, vector<1x8x32xf32>,
    return
  }
  func.func @transform_0(%arg0: i32, %arg1: i32) -> (i32, i32, i32) {
    %c0_i32 = arith.constant 0 : i32
    %c0_i32_0 = arith.constant 0 : i32
    return %arg0, %arg1, %c0_i32 : i32, i32, i32
  }
  func.func @transform_1(%arg0: i32, %arg1: i32) -> (i32, i32, i32) {
    %c0_i32 = arith.constant 0 : i32
    %c0_i32_0 = arith.constant 0 : i32
    %c0_i32_1 = arith.constant 0 : i32
    return %arg0, %c0_i32, %c0_i32_0 : i32, i32, i32
  }
  func.func @transform_2(%arg0: i32, %arg1: i32) -> (i32, i32) {
    %c0_i32 = arith.constant 0 : i32
    %c0_i32_0 = arith.constant 0 : i32
    %c0_i32_1 = arith.constant 0 : i32
    return %c0_i32, %c0_i32_0 : i32, i32
  }
  func.func @transform_3(%arg0: i32, %arg1: i32) -> (i32, i32) {
    %c0_i32 = arith.constant 0 : i32
    %c0_i32_0 = arith.constant 0 : i32
    %c0_i32_1 = arith.constant 0 : i32
    return %c0_i32, %c0_i32_0 : i32, i32
  }
  func.func @transform_4(%arg0: i32, %arg1: i32) -> (i32, i32) {
    %c0_i32 = arith.constant 0 : i32
    %c0_i32_0 = arith.constant 0 : i32
    %c0_i32_1 = arith.constant 0 : i32
    return %c0_i32, %c0_i32_0 : i32, i32
  }
  func.func @transform_5(%arg0: i32, %arg1: i32) -> (i32, i32) {
    %c0_i32 = arith.constant 0 : i32
    %c0_i32_0 = arith.constant 0 : i32
    %c0_i32_1 = arith.constant 0 : i32
    return %c0_i32, %c0_i32_0 : i32, i32
  }
  func.func @transform_6(%arg0: i32, %arg1: i32) -> (i32, i32) {
    %c0_i32 = arith.constant 0 : i32
    %c0_i32_0 = arith.constant 0 : i32
    %c0_i32_1 = arith.constant 0 : i32
    return %c0_i32, %c0_i32_0 : i32, i32
  }
  func.func @transform_7(%arg0: i32, %arg1: i32) -> (i32, i32) {
    %c0_i32 = arith.constant 0 : i32
    %c0_i32_0 = arith.constant 0 : i32
    %c0_i32_1 = arith.constant 0 : i32
    return %c0_i32, %c0_i32_0 : i32, i32
  }
  func.func @transform_8(%arg0: i32, %arg1: i32) -> (i32, i32) {
    %c0_i32 = arith.constant 0 : i32
    %c0_i32_0 = arith.constant 0 : i32
    %c0_i32_1 = arith.constant 0 : i32
    return %c0_i32, %c0_i32_0 : i32, i32
  }
  func.func @transform_9(%arg0: i32, %arg1: i32) -> (i32, i32) {
    %c0_i32 = arith.constant 0 : i32
    %c0_i32_0 = arith.constant 0 : i32
    %c0_i32_1 = arith.constant 0 : i32
    return %c0_i32, %c0_i32_0 : i32, i32
  }
  func.func @transform_10(%arg0: i32, %arg1: i32) -> (i32, i32) {
    %c0_i32 = arith.constant 0 : i32
    %c0_i32_0 = arith.constant 0 : i32
    %c0_i32_1 = arith.constant 0 : i32
    return %c0_i32, %c0_i32_0 : i32, i32
  }
  func.func @transform_11(%arg0: i32, %arg1: i32) -> (i32, i32) {
    %c0_i32 = arith.constant 0 : i32
    %c0_i32_0 = arith.constant 0 : i32
    %c0_i32_1 = arith.constant 0 : i32
    return %c0_i32, %c0_i32_0 : i32, i32
  }
  func.func @transform_12(%arg0: i32, %arg1: i32) -> (i32, i32) {
    %c0_i32 = arith.constant 0 : i32
    %c0_i32_0 = arith.constant 0 : i32
    %c0_i32_1 = arith.constant 0 : i32
    return %c0_i32, %c0_i32_0 : i32, i32
  }
  func.func @transform_13(%arg0: i32, %arg1: i32) -> (i32, i32) {
    %c0_i32 = arith.constant 0 : i32
    %c0_i32_0 = arith.constant 0 : i32
    %c0_i32_1 = arith.constant 0 : i32
    return %c0_i32, %c0_i32_0 : i32, i32
  }
  func.func @transform_14(%arg0: i32, %arg1: i32) -> (i32, i32) {
    %c0_i32 = arith.constant 0 : i32
    %c0_i32_0 = arith.constant 0 : i32
    %c0_i32_1 = arith.constant 0 : i32
    return %c0_i32, %c0_i32_0 : i32, i32
  }
  func.func @transform_15(%arg0: i32, %arg1: i32) -> (i32, i32) {
    %c0_i32 = arith.constant 0 : i32
    %c0_i32_0 = arith.constant 0 : i32
    %c0_i32_1 = arith.constant 0 : i32
    return %c0_i32, %c0_i32_0 : i32, i32
  }
  func.func @transform_16(%arg0: i32, %arg1: i32) -> (i32, i32, i32) {
    %c0_i32 = arith.constant 0 : i32
    %c0_i32_0 = arith.constant 0 : i32
    return %arg0, %arg1, %c0_i32 : i32, i32, i32
  }
}

</mosaic_0001>

<bundles_post_ra>
// kernel: tpu_custom_call.1
= control target key start
LH: loop header
LB: loop body
LE: loop exit
PB: predicated region body
PF: predicated region fallthrough
CT: control target
= control target key end

     0   :  { %s5146_s0 = inlined_call_operand.vmem [shape: f32[2,8,32], index: 0, kind: input, shape index: {}]   ;;  %s5147_s1 = inlined_call_operand.vmem [shape: bf16[2,8,32], index: 1, kind: input, shape index: {}]   ;;  %s5148_s2 = inlined_call_operand.vmem [shape: bf16[32,32], index: 2, kind: input, shape index: {}]   ;;  %s5149_s3 = inlined_call_operand.vmem [shape: f32[1,32], index: 3, kind: input, shape index: {}]   ;;  %s5150_s4 = inlined_call_operand.vmem [shape: bf16[32,64], index: 4, kind: input, shape index: {}]   ;;  %s5151_s5 = inlined_call_operand.vmem [shape: f32[1,64], index: 5, kind: input, shape index: {}]   ;;  %s5152_s6 = inlined_call_operand.vmem [shape: bf16[32,32], index: 6, kind: input, shape index: {}]   ;;  %s5153_s7 = inlined_call_operand.vmem [shape: f32[1,32], index: 7, kind: input, shape index: {}]   ;;  %s5154_s8 = inlined_call_operand.vmem [shape: f32[1,32], index: 8, kind: input, shape index: {}]   ;;  %s5155_s9 = inlined_call_operand.vmem [shape: f32[1,32], index: 9, kind: input, shape index: {}]   ;;  %s5156_s10 = inlined_call_operand.vmem [shape: bf16[32,2048], index: 10, kind: input, shape index: {}]   ;;  %s5157_s11 = inlined_call_operand.vmem [shape: f32[1,2048], index: 11, kind: input, shape index: {}]   ;;  %s5158_s12 = inlined_call_operand.vmem [shape: bf16[2048,32], index: 12, kind: input, shape index: {}]   ;;  %s5159_s13 = inlined_call_operand.vmem [shape: f32[1,32], index: 13, kind: input, shape index: {}]   ;;  %s5160_s14 = inlined_call_operand.vmem [shape: f32[1,32], index: 14, kind: input, shape index: {}]   ;;  %s5161_s15 = inlined_call_operand.vmem [shape: f32[1,32], index: 15, kind: input, shape index: {}]   ;;  %s5162_s16 = inlined_call_operand.hbm [shape: f32[2,8,32], index: 16, kind: output, shape index: {}]  }
   0x1   :  { %5168 = sst [smem:[#allocation13_spill]] %s5146_s0 }
   0x2   :  { %5169 = sst [smem:[#allocation14_spill]] %s5150_s4 }
   0x3   :  { %21 = vsyncpa [#allocation5], 0 }
   0x4   :  { %23 = vsyncpa [#allocation5 + $0x1], 0  ;;  %s4305_s21 = smov 0   ;;  %s4307_s22 = smov 0  }
   0x5   :  { %s4309_s23 = smov 0   ;;  %s4311_s24 = smov 0  }
   0x6   :  { %s4313_s25 = smov 0   ;;  %s4315_s26 = smov 0  }
   0x7 LB: > { %5170 = sst [smem:[#allocation7_spill]] %s4184_s21  ;;  %s3412_s27 = sadd.s32 4294967295, %s4204_s26   ;;  %s4204_s26 = sphi %s4315_s26, %s29_s26   ;;  %s4200_s25 = sphi %s4313_s25, %s5185_s25   ;;  %s4196_s24 = sphi %s4311_s24, %s5184_s24   ;;  %s4192_s23 = sphi %s4309_s23, %s5188_s23   ;;  %s4188_s22 = sphi %s4307_s22, %s5187_s22   ;;  %s4184_s21 = sphi %s4305_s21, %s5186_s21  }
   0x8   : > { %5171 = sst [smem:[#allocation8_spill]] %s4192_s23  ;;  %s3413_s28 = sadd.s32 4294967294, %s4204_s26  }
   0x9   : > { %5172 = sst [smem:[#allocation9_spill]] %s4200_s25  ;;  %s41_s29 = sadd.s32 1, %s4200_s25 }
   0xa   : > { %s398_s30 = sadd.s32 1, %s4192_s23  ;;  %p43_p0 = scmp.ge.s32.totalorder %s41_s29, 2 }
   0xb   : > { %p408_p1 = scmp.ne.s32.totalorder %s4192_s23, %s4188_s22  ;;  %p409_p2 = scmp.eq.s32.totalorder %s3412_s27, 1 }
   0xc   : > { %p414_p3 = scmp.ne.s32.totalorder %s4188_s22, %s4184_s21  ;;  %s5190_s29 = smov (%p43_p0, %s41_s29), 0 }
   0xd   : > { %5173 = sst [smem:[#allocation10_spill]] %s5190_s29  ;;  %p4345_p4 = por %p409_p2, %p408_p1 }
   0xe   : > { %p415_p5 = scmp.eq.s32.totalorder %s3413_s28, 1  ;;  %s393_s17 = ssub.s32 %s4200_s25, %s5190_s29 }
   0xf   : > { %p3416_p6 = scmp.ge.s32.totalorder %s4204_s26, 1  ;;  %p396_p7 = scmp.eq.s32.totalorder %s393_s17, 0 }
  0x10   : > { %p4352_p8 = por %p415_p5, %p414_p3  ;;  %p492_p9 = scmp.lt.s32.totalorder %s4204_s26, 3 }
  0x11   : > { %s4358_s19 = scalar_select %p396_p7, %s4192_s23, %s398_s30  }
  0x12   : > { %s5175_s18 = scalar_select %p4352_p8, 1, 0 }
  0x13   : > { %5177 = sst [smem:[#allocation12_spill]] %s4358_s19  ;;  %p493_p10 = pnand %p3416_p6, %p492_p9 }
  0x14   : > { %5176 = sst [smem:[#allocation11_spill]] %s5175_s18  ;;  %s5178_s4 = sld [smem:[#allocation14_spill]] (!%p493_p10)  ;;  %v4206_v1 = vmov (!%p493_p10), 0.0   ;;  %vm4207_vm0 = vmmov (!%p493_p10), 0   ;;  %v3970_v3 = vld [vmem:[%s5148_s2] sm:$0xff] (!%p493_p10)   ;;  %vm588_vm1 = vcmask (!%p493_p10), 261120  }
  0x15   : > { %496 = sbr.rel (%p493_p10) target bundleno = 2378 (0x94a), region = 84  ;;  %3828 = vmatprep.subr.bf16.mxu0 (!%p493_p10), %v4206_v1  ;;  %3836 = vmatprep.subr.bf16.mxu1 (!%p493_p10), %v4206_v1  ;;  %p548_p11 = scmp.lt.s32.totalorder (!%p493_p10), %s4196_s24, 1  ;;  %v3971_v4 = vld [vmem:[%s5148_s2 + $0x8] sm:$0xff] (!%p493_p10)   ;;  %v3420_v8 = vld [vmem:[%s5151_s5] ss:$0 sm:$0xff] (!%p493_p10)  ;;  %vm633_vm2 = vcmask (!%p493_p10), 519168  }
  0x16   : > { %3832 = vmatprep.mubr.msk.bf16.mxu0 (!%p493_p10), %vm4207_vm0, %v4206_v1  ;;  %3840 = vmatprep.mubr.msk.bf16.mxu1 (!%p493_p10), %vm4207_vm0, %v4206_v1  ;;  %s5179_s23 = sld [smem:[#allocation13_spill]] (!%p493_p10)  ;;  %v3424_v19 = vld [vmem:[%s5149_s3] ss:$0 sm:$0xff] (!%p493_p10)  ;;  %vm706_vm3 = vcmask (!%p493_p10), 64512   ;;  %s4208_s29 = smov (!%p493_p10), 112   ;;  %vm773_vm4 = vcmask (!%p493_p10), 1043456  }
  0x17   : > { %3837 = vmatpush3.bf16.msra.mxu1 (!%p493_p10), %v3970_v3  ;;  %s4209_s18 = smov (!%p493_p10), 120   ;;  %s4210_s19 = smov (!%p493_p10), 104   ;;  %vm818_vm5 = vcmask (!%p493_p10), 60416   ;;  %vm942_vm6 = vcmask (!%p493_p10), 126016   ;;  %vm1065_vm7 = vcmask (!%p493_p10), 191616   ;;  %vm1188_vm8 = vcmask (!%p493_p10), 257216  }
  0x18   : > { %3838 = vmatprep.subr.bf16.mxu1 (!%p493_p10), %v4206_v1  ;;  %s4215_s20 = smov (!%p493_p10), 8  }
  0x1a   : > { %v3968_v0 = vld [vmem:[%s5178_s4] sm:$0xff] (!%p493_p10)   ;;  %v3969_v2 = vld [vmem:[%s5178_s4 + $0x8] sm:$0xff] (!%p493_p10)  }
  0x1b   : > { %3829 = vmatpush3.bf16.msra.mxu0 (!%p493_p10), %v3968_v0  ;;  %3839 = vmatpush3.bf16.msra.mxu1 (!%p493_p10), %v3971_v4 }
  0x1c   : > { %3830 = vmatprep.subr.bf16.mxu0 %v4206_v1  ;;  %s549_s27 = scalar_select %p548_p11, %s4196_s24, 1  ;;  %3850 = vmatprep.subr.bf16.mxu1 %v4206_v1 }
  0x1e   : > { %s3418_s28 = sshll.u32 %s549_s27, 3  ;;  %s3419_s17 = sshll.u32 %s549_s27, 2 }
  0x1f   : > { %3831 = vmatpush3.bf16.msra.mxu0 %v3969_v2  ;;  %s554_s30 = scalar_lea.vmem %s5179_s23, %s3418_s28  ;;  %s558_s21 = scalar_lea.vmem %s5147_s1, %s3419_s17 }
  0x20   : > { %3844 = vmatprep.subr.bf16.mxu0 %v4206_v1  ;;  %v564_v5 = vld [vmem:[%s558_s21] sm:$0xf]  ;;  %s4211_s27 = smov 96   ;;  %s4212_s28 = smov 80  }
  0x21   : > { %v4389_v6 = vld [vmem:[%s554_s30] sm:$0xff]  ;;  %s4213_s17 = smov 72   ;;  %s4214_s30 = smov 88  }
  0x22   : > { %3833 = vmatmul.mubr.msk.bf16.vlgmr.msra.gmra.mrb[0].mxu0 %vm588_vm1, %v564_v5  ;;  %v636_v7 = vpack.c.bf16 %v4389_v6, %v4389_v6  ;;  %s545_s23 = sand.u32 1, %s4188_s22  }
  0x23   : > { %3846 = vmatprep.mubr.msk.bf16.mxu0 %vm4207_vm0, %v4206_v1  ;;  %s3417_s25 = sshll.u32 %s545_s23, 3 }
  0x24   : > { %3841 = vmatmul.mubr.msk.bf16.vlgmr.msra.gmra.mrb[0].mxu1 %vm588_vm1, %v636_v7 }
  0x25   : > { %3852 = vmatprep.mubr.msk.bf16.mxu1 %vm4207_vm0, %v4206_v1 }
  0xf5   : > { %v626_v9 = vpop.f32.mrb[0].mxu0 }
  0xf6   : > { %v627_v10 = vadd.f32 %v3420_v8, %v626_v9  ;;  %v3834_v11 = vpop.f32.mrb[1].mxu0 }
  0xf7   : > { %v629_v12 = vpop.f32.mrb[2].mxu0  ;;  %v698_v15 = vpop.f32.mrb[0].mxu1 }
  0xf8   : > { %v632_v13 = vpack.c.bf16 %v627_v10, %v627_v10  ;;  %v3835_v14 = vpop.f32.mrb[3].mxu0  ;;  %v3842_v16 = vpop.f32.mrb[1].mxu1  ;;  %v699_v20 = vadd.f32 %v3424_v19, %v698_v15 }
  0xf9   : > { %v701_v17 = vpop.f32.mrb[2].mxu1 }
  0xfa   : > { %634 = vst.msk [vmem:[#allocation2] sm:$0xf] %vm633_vm2, %v632_v13  ;;  %v3843_v18 = vpop.f32.mrb[3].mxu1  ;;  %v704_v25 = vpack.c.bf16 %v699_v20, %v699_v20 }
 0x101   : > { %v4406_v21 = vld [vmem:[#allocation2] sm:$0xf] }
 0x102   : > { %v4408_v22 = vld [vmem:[#allocation2] ss:$0 sps:$4 sm:$0xff]   ;;  %v711_v23 = vsel %vm706_vm3, %v4406_v21, 0  ;;  %v3429_v61 = vcombine.low %v4406_v21, %v4406_v21 }
 0x103   : > { %v4412_v24 = vld [vmem:[#allocation2] ss:$0 sps:$4 sm:$0xff]   ;;  %3845 = vmatpush3.bf16.xpose.msra.mxu0 %v711_v23  ;;  %950 = vrot.lane.b32.xlu1 %v4408_v22, %s4208_s29 }
 0x104   : > { %827 = vrot.lane.b32.xlu0 %v4412_v24, %s4209_s18  ;;  %3856 = vmatprep.subr.bf16.mxu0 %v4206_v1  ;;  %v4418_v26 = vld [vmem:[#allocation2] ss:$0 sps:$4 sm:$0xff]  }
 0x107   : > { %945 = vrot.lane.b32.xlu1 %v704_v25, %s4208_s29  ;;  %s4216_s29 = smov 16  }
 0x108   : > { %822 = vrot.lane.b32.xlu0 %v704_v25, %s4209_s18  ;;  %s4217_s18 = smov 24  }
 0x10a   : > { %3847 = vmatmul.mubr.msk.bf16.vlgmr.msra.gmra.mrb[4].mxu0 %vm706_vm3, %v704_v25 }
 0x10b   : > { %1068 = vrot.lane.b32.xlu1 %v704_v25, %s4210_s19  ;;  %3858 = vmatprep.mubr.msk.bf16.mxu0 %vm4207_vm0, %v4206_v1 }
 0x10c   : > { %1073 = vrot.lane.b32.xlu0 %v4418_v26, %s4210_s19 }
 0x175   : > { %v951_v29 = vpop.permute.xlu1 %950 }
 0x176   : > { %v828_v27 = vpop.permute.xlu0 %827  ;;  %v956_v31 = vsel %vm706_vm3, %v951_v29, 0 }
 0x177   : > { %v833_v28 = vsel %vm706_vm3, %v828_v27, 0 }
 0x178   : > { %3857 = vmatpush3.bf16.xpose.msra.mxu0 %v833_v28 }
 0x179   : > { %3868 = vmatprep.subr.bf16.mxu0 %v4206_v1  ;;  %v946_v33 = vpop.permute.xlu1 %945 }
 0x17a   : > { %v823_v30 = vpop.permute.xlu0 %822 }
 0x17d   : > { %v1069_v35 = vpop.permute.xlu1 %1068 }
 0x17e   : > { %v1074_v32 = vpop.permute.xlu0 %1073 }
 0x17f   : > { %3859 = vmatmul.mubr.msk.bf16.vlgmr.msra.gmra.mrb[8].mxu0 %vm706_vm3, %v823_v30  ;;  %v1079_v34 = vsel %vm706_vm3, %v1074_v32, 0 }
 0x180   : > { %3869 = vmatpush3.bf16.xpose.msra.mxu0 %v956_v31  ;;  %3870 = vmatprep.mubr.msk.bf16.mxu0 %vm4207_vm0, %v4206_v1 }
 0x181   : > { %3880 = vmatprep.subr.bf16.mxu0 %v4206_v1 }
 0x187   : > { %3871 = vmatmul.mubr.msk.bf16.vlgmr.msra.gmra.mrb[12].mxu0 %vm706_vm3, %v946_v33 }
 0x188   : > { %3881 = vmatpush3.bf16.xpose.msra.mxu0 %v1079_v34  ;;  %3882 = vmatprep.mubr.msk.bf16.mxu0 %vm4207_vm0, %v4206_v1 }
 0x189   : > { %3892 = vmatprep.subr.bf16.mxu0 %v4206_v1 }
 0x18f   : > { %3883 = vmatmul.mubr.msk.bf16.vlgmr.msra.gmra.mrb[16].mxu0 %vm706_vm3, %v1069_v35 }
 0x190   : > { %3896 = vmatprep.mubr.msk.bf16.mxu0 %vm4207_vm0, %v4206_v1 }
 0x1dd   : > { %v747_v36 = vpop.f32.mrb[4].mxu0 }
 0x1de   : > { %v3848_v37 = vpop.f32.mrb[5].mxu0  ;;  %v753_v38 = vsel %vm706_vm3, %v747_v36, -inf }
 0x1df   : > { %754 = vmax.xlane.f32.xlu0 %v753_v38  ;;  %v750_v39 = vpop.f32.mrb[6].mxu0 }
 0x1e0   : > { %v3849_v40 = vpop.f32.mrb[7].mxu0 }
 0x252   : > { %v869_v41 = vpop.f32.mrb[8].mxu0 }
 0x253   : > { %v3860_v42 = vpop.f32.mrb[9].mxu0  ;;  %v875_v43 = vsel %vm706_vm3, %v869_v41, -inf }
 0x254   : > { %876 = vmax.xlane.f32.xlu1 %v875_v43  ;;  %v872_v44 = vpop.f32.mrb[10].mxu0 }
 0x255   : > { %v3861_v45 = vpop.f32.mrb[11].mxu0 }
 0x25a   : > { %v992_v46 = vpop.f32.mrb[12].mxu0 }
 0x25b   : > { %v3872_v47 = vpop.f32.mrb[13].mxu0  ;;  %v998_v48 = vsel %vm706_vm3, %v992_v46, -inf }
 0x25c   : > { %999 = vmax.xlane.f32.xlu0 %v998_v48  ;;  %v995_v49 = vpop.f32.mrb[14].mxu0 }
 0x25d   : > { %v3873_v50 = vpop.f32.mrb[15].mxu0  ;;  %v3976_v49 = vld [vmem:[%s5152_s6] sm:$0xff]  }
 0x25e   : > { %3893 = vmatpush3.bf16.msra.mxu0 %v3976_v49  ;;  %v1309_v49 = vld [vmem:[%s5156_s10 + $0x90] sm:$0xff] }
 0x25f   : > { %3894 = vmatprep.subr.bf16.mxu0 %v4206_v1 }
 0x262   : > { %v1115_v51 = vpop.f32.mrb[16].mxu0 }
 0x263   : > { %v3884_v52 = vpop.f32.mrb[17].mxu0  ;;  %v1121_v53 = vsel %vm706_vm3, %v1115_v51, -inf }
 0x264   : > { %1122 = vmax.xlane.f32.xlu0 %v1121_v53  ;;  %v1118_v54 = vpop.f32.mrb[18].mxu0 }
 0x265   : > { %v3885_v55 = vpop.f32.mrb[19].mxu0 }
 0x26c   : > { %v755_v56 = vpop.xlane.xlu0 %754 }
 0x26d   : > { %v756_v57 = vsub.f32 %v747_v36, %v755_v56 }
 0x26f   : > { %v757_v58 = vmul.f32 1.442695, %v756_v57 }
 0x271   : > { %4106 = vpow2.f32 %v757_v58 }
 0x27b   : > { %v4107_v59 = vpop.eup %4106 }
 0x27c   : > { %v759_v60 = vsel %vm706_vm3, %v4107_v59, 0.0 }
 0x27d   : > { %760 = vadd.xlane.f32.xlu1 %v759_v60 }
 0x28e   : > { %768 = vrot.lane.b32.xlu1 %v3429_v61, %s4211_s27 }
 0x2e1   : > { %v877_v62 = vpop.xlane.xlu1 %876 }
 0x2e2   : > { %v878_v63 = vsub.f32 %v869_v41, %v877_v62 }
 0x2e4   : > { %v879_v0 = vmul.f32 1.442695, %v878_v63 }
 0x2e6   : > { %4108 = vpow2.f32 %v879_v0  ;;  %v3443_v0 = vld [vmem:[%s5153_s7] ss:$0 sm:$0xff] }
 0x2e9   : > { %v1000_v2 = vpop.xlane.xlu0 %999 }
 0x2ea   : > { %v1001_v3 = vsub.f32 %v992_v46, %v1000_v2 }
 0x2ec   : > { %v1002_v4 = vmul.f32 1.442695, %v1001_v3 }
 0x2ee   : > { %4110 = vpow2.f32 %v1002_v4 }
 0x2f0   : > { %v4109_v5 = vpop.eup %4108 }
 0x2f1   : > { %v1123_v7 = vpop.xlane.xlu0 %1122  ;;  %v881_v8 = vsel %vm706_vm3, %v4109_v5, 0.0 }
 0x2f2   : > { %v1124_v9 = vsub.f32 %v1115_v51, %v1123_v7  ;;  %882 = vadd.xlane.f32.xlu0 %v881_v8  ;;  %v3977_v51 = vld [vmem:[%s5152_s6 + $0x8] sm:$0xff]  }
 0x2f3   : > { %3895 = vmatpush3.bf16.msra.mxu0 %v3977_v51  ;;  %v1310_v51 = vld [vmem:[%s5156_s10 + $0x98] sm:$0xff] }
 0x2f4   : > { %v1125_v10 = vmul.f32 1.442695, %v1124_v9 }
 0x2f6   : > { %4112 = vpow2.f32 %v1125_v10 }
 0x2f8   : > { %v4111_v11 = vpop.eup %4110 }
 0x2f9   : > { %v1004_v12 = vsel %vm706_vm3, %v4111_v11, 0.0 }
 0x2fa   : > { %1005 = vadd.xlane.f32.xlu1 %v1004_v12  ;;  %v1291_v12 = vld [vmem:[%s5156_s10] sm:$0xff] }
 0x300   : > { %v4113_v13 = vpop.eup %4112 }
 0x301   : > { %v1127_v14 = vsel %vm706_vm3, %v4113_v13, 0.0 }
 0x302   : > { %1128 = vadd.xlane.f32.xlu0 %v1127_v14 }
 0x30a   : > { %v761_v15 = vpop.xlane.xlu1 %760 }
 0x30b   : > { %4114 = vrcp.f32 %v761_v15  ;;  %1010 = vrot.lane.b32.xlu1 %v4408_v22, %s4212_s28  ;;  %v1300_v15 = vld [vmem:[%s5156_s10 + $0x48] sm:$0xff]  ;;  %s3621_s28 = sshll.u32 %s4196_s24, 7  ;;  %s4219_s24 = smov [#allocation4]  }
 0x30c   : > { %s5098_s21 = scalar_lea.hbm %s5162_s16, %s3621_s28 }
 0x30e   : > { %v769_v16 = vpop.permute.xlu1 %768 }
 0x30f   : > { %v775_v17 = vsel %vm773_vm4, %v769_v16, 0  ;;  %1133 = vrot.lane.b32.xlu1 %v4418_v26, %s4213_s17  ;;  %s547_s17 = scalar_lea.vmem [#allocation4], %s3417_s25  ;;  %s4130_s25 = sshll.u32 %s4219_s24, 4  ;;  %s4131_s25 = int_to_ptr.vmem [resolvable:$false] %s4130_s25 }
 0x310   : > { %3851 = vmatpush3.bf16.msra.mxu1 %v775_v17  ;;  %s4132_s19 = scalar_lea.vmem %s4131_s25, 256 }
 0x311   : > { %3862 = vmatprep.subr.bf16.mxu1 %v4206_v1 }
 0x315   : > { %v4115_v18 = vpop.eup %4114 }
 0x316   : > { %v763_v19 = vmul.f32 %v4115_v18, %v4107_v59 }
 0x318   : > { %887 = vrot.lane.b32.xlu0 %v4412_v24, %s4214_s30  ;;  %v764_v20 = vpack.c.bf16 %v763_v19, %v763_v19  ;;  %v1307_v19 = vld [vmem:[%s5156_s10 + $0x80] sm:$0xff]  ;;  %s3329_s30 = sshll.u32 %s547_s17, 4  ;;  %s5100_s30 = int_to_ptr.vmem [resolvable:$true] %s3329_s30 }
 0x319   : > { %p4133_p1 = scmp.lt.s32.totalorder %s5100_s30, %s4131_s25 }
 0x31a   : > { %3853 = vmatmul.mubr.msk.bf16.vlgmr.msra.gmra.mrb[4].mxu1 %vm706_vm3, %v764_v20  ;;  %v1315_v20 = vld [vmem:[%s5156_s10 + $0xc0] sm:$0xff] }
 0x31b   : > { %3864 = vmatprep.mubr.msk.bf16.mxu1 %vm4207_vm0, %v4206_v1 }
 0x37f   : > { %v883_v21 = vpop.xlane.xlu0 %882 }
 0x380   : > { %4116 = vrcp.f32 %v883_v21  ;;  %v1308_v21 = vld [vmem:[%s5156_s10 + $0x88] sm:$0xff] }
 0x387   : > { %v1006_v22 = vpop.xlane.xlu1 %1005 }
 0x388   : > { %4118 = vrcp.f32 %v1006_v22  ;;  %v3466_v22 = vcombine.high %v1307_v19, %v1315_v20 }
 0x38a   : > { %v4117_v23 = vpop.eup %4116 }
 0x38b   : > { %v885_v26 = vmul.f32 %v4117_v23, %v4109_v5  ;;  %v1011_v29 = vpop.permute.xlu1 %1010  ;;  %v1316_v23 = vld [vmem:[%s5156_s10 + $0xc8] sm:$0xff] }
 0x38c   : > { %v1016_v31 = vsel %vm773_vm4, %v1011_v29, 0  ;;  %v1301_v29 = vld [vmem:[%s5156_s10 + $0x50] sm:$0xff] }
 0x38d   : > { %v886_v24 = vpack.c.bf16 %v885_v26, %v885_v26  ;;  %v3467_v26 = vcombine.low %v1308_v21, %v1316_v23 }
 0x38f   : > { %v1129_v25 = vpop.xlane.xlu0 %1128  ;;  %v1134_v33 = vpop.permute.xlu1 %1133 }
 0x390   : > { %4120 = vrcp.f32 %v1129_v25  ;;  %v1139_v36 = vsel %vm773_vm4, %v1134_v33, 0  ;;  %v3465_v25 = vcombine.low %v1307_v19, %v1315_v20  ;;  %v1314_v19 = vld [vmem:[%s5156_s10 + $0xb8] sm:$0xff] }
 0x391   : > { %v1322_v20 = vld [vmem:[%s5156_s10 + $0xf8] sm:$0xff] }
 0x392   : > { %v4119_v30 = vpop.eup %4118 }
 0x393   : > { %v888_v27 = vpop.permute.xlu0 %887  ;;  %v1008_v32 = vmul.f32 %v4119_v30, %v4111_v11  ;;  %v4218_v30 = vmov 0  }
 0x394   : > { %v893_v28 = vsel %vm773_vm4, %v888_v27, 0  ;;  %v3468_v27 = vcombine.high %v1308_v21, %v1316_v23 }
 0x395   : > { %3863 = vmatpush3.bf16.msra.mxu1 %v893_v28  ;;  %v1009_v34 = vpack.c.bf16 %v1008_v32, %v1008_v32  ;;  %v1293_v28 = vld [vmem:[%s5156_s10 + $0x10] sm:$0xff]  ;;  %v1302_v32 = vld [vmem:[%s5156_s10 + $0x58] sm:$0xff] }
 0x396   : > { %3874 = vmatprep.subr.bf16.mxu1 %v4206_v1  ;;  %v3453_v33 = vcombine.low %v1293_v28, %v1301_v29 }
 0x398   : > { %3865 = vmatmul.mubr.msk.bf16.vlgmr.msra.gmra.mrb[8].mxu1 %vm706_vm3, %v886_v24  ;;  %v1294_v24 = vld [vmem:[%s5156_s10 + $0x18] sm:$0xff] }
 0x399   : > { %3875 = vmatpush3.bf16.msra.mxu1 %v1016_v31  ;;  %3876 = vmatprep.mubr.msk.bf16.mxu1 %vm4207_vm0, %v4206_v1  ;;  %v3454_v31 = vcombine.high %v1293_v28, %v1301_v29  ;;  %v3978_v28 = vld [vmem:[%s5158_s12 + $0x40] sm:$0xff]  }
 0x39a   : > { %3886 = vmatprep.subr.bf16.mxu1 %v4206_v1  ;;  %v4121_v35 = vpop.eup %4120  ;;  %v3979_v29 = vld [vmem:[%s5158_s12 + $0xc0] sm:$0xff]  }
 0x39b   : > { %v1131_v37 = vmul.f32 %v4121_v35, %v4113_v13  ;;  %v1299_v13 = vld [vmem:[%s5156_s10 + $0x40] sm:$0xff]  ;;  %v3456_v35 = vcombine.high %v1294_v24, %v1302_v32 }
 0x39c   : > { %v3450_v14 = vcombine.high %v1291_v12, %v1299_v13  ;;  %v3449_v16 = vcombine.low %v1291_v12, %v1299_v13  ;;  %v1298_v12 = vld [vmem:[%s5156_s10 + $0x38] sm:$0xff] }
 0x39d   : > { %v1132_v38 = vpack.c.bf16 %v1131_v37, %v1131_v37  ;;  %v1306_v13 = vld [vmem:[%s5156_s10 + $0x78] sm:$0xff] }
 0x3a0   : > { %3877 = vmatmul.mubr.msk.bf16.vlgmr.msra.gmra.mrb[12].mxu1 %vm706_vm3, %v1009_v34  ;;  %v3455_v34 = vcombine.low %v1294_v24, %v1302_v32  ;;  %v3980_v24 = vld [vmem:[%s5158_s12] sm:$0xff]   ;;  %v3982_v32 = vld [vmem:[%s5158_s12 + $0x48] sm:$0xff]  }
 0x3a1   : > { %3887 = vmatpush3.bf16.msra.mxu1 %v1139_v36  ;;  %3888 = vmatprep.mubr.msk.bf16.mxu1 %vm4207_vm0, %v4206_v1 }
 0x3a2   : > { %1570 = vmatprep.subr.bf16.mxu1 %v3450_v14 }
 0x3a8   : > { %3889 = vmatmul.mubr.msk.bf16.vlgmr.msra.gmra.mrb[16].mxu1 %vm706_vm3, %v1132_v38 }
 0x3a9   : > { %1571 = vmatpush1.bf16.msra.mxu1 %v3449_v16  ;;  %1602 = vmatprep.mubr.bf16.mxu1 %v4218_v30  ;;  %v3464_v16 = vcombine.high %v1298_v12, %v1306_v13 }
 0x3aa   : > { %1572 = vmatprep.subr.bf16.mxu1 %v3466_v22  ;;  %v3463_v22 = vcombine.low %v1298_v12, %v1306_v13 }
 0x3ad   : > { %1573 = vmatpush1.bf16.msra.mxu1 %v3465_v25  ;;  %v3480_v25 = vcombine.high %v1314_v19, %v1322_v20 }
 0x3ae   : > { %1652 = vmatprep.subr.bf16.mxu1 %v3454_v31  ;;  %v3981_v31 = vld [vmem:[%s5158_s12 + $0x80] sm:$0xff]  }
 0x3ed   : > { %v811_v39 = vpop.f32.mrb[4].mxu1 }
 0x3ee   : > { %v817_v40 = vpack.c.bf16 %v811_v39, %v811_v39  ;;  %v3854_v41 = vpop.f32.mrb[5].mxu1 }
 0x3ef   : > { %v814_v42 = vpop.f32.mrb[6].mxu1 }
 0x3f0   : > { %819 = vst.msk [vmem:[#allocation3] sm:$0xf] %vm818_vm5, %v817_v40  ;;  %v3855_v43 = vpop.f32.mrb[7].mxu1 }
 0x46b   : > { %v929_v44 = vpop.f32.mrb[8].mxu1 }
 0x46c   : > { %v3624_v45 = vpack.c.bf16 %v929_v44, %v929_v44  ;;  %v3866_v46 = vpop.f32.mrb[9].mxu1 }
 0x46d   : > { %v932_v47 = vpop.f32.mrb[10].mxu1 }
 0x46e   : > { %939 = vrot.lane.b32.xlu0 %v3624_v45, %s4215_s20  ;;  %v3867_v48 = vpop.f32.mrb[11].mxu1  ;;  %v3447_v45 = vld [vmem:[%s5154_s8] ss:$0 sm:$0xff] }
 0x46f   : > { %v3448_v47 = vld [vmem:[%s5155_s9] ss:$0 sm:$0xff] }
 0x473   : > { %v1052_v50 = vpop.f32.mrb[12].mxu1 }
 0x474   : > { %v3625_v52 = vpack.c.bf16 %v1052_v50, %v1052_v50  ;;  %v3878_v53 = vpop.f32.mrb[13].mxu1  ;;  %v1317_v50 = vld [vmem:[%s5156_s10 + $0xd0] sm:$0xff] }
 0x475   : > { %v1055_v54 = vpop.f32.mrb[14].mxu1 }
 0x476   : > { %1062 = vrot.lane.b32.xlu1 %v3625_v52, %s4216_s29  ;;  %v3879_v55 = vpop.f32.mrb[15].mxu1  ;;  %v1318_v52 = vld [vmem:[%s5156_s10 + $0xd8] sm:$0xff]  ;;  %s3315_s29 = scalar_lea.sflag [#allocation5], %s545_s23 }
 0x477   : > { %v3470_v55 = vcombine.high %v1309_v49, %v1317_v50 }
 0x47b   : > { %v1175_v56 = vpop.f32.mrb[16].mxu1 }
 0x47c   : > { %v3626_v57 = vpack.c.bf16 %v1175_v56, %v1175_v56  ;;  %v3890_v58 = vpop.f32.mrb[17].mxu1  ;;  %v3472_v56 = vcombine.high %v1310_v51, %v1318_v52 }
 0x47d   : > { %v1178_v59 = vpop.f32.mrb[18].mxu1  ;;  %v1303_v58 = vld [vmem:[%s5156_s10 + $0x60] sm:$0xff] }
 0x47e   : > { %1185 = vrot.lane.b32.xlu0 %v3626_v57, %s4217_s18  ;;  %v3891_v60 = vpop.f32.mrb[19].mxu1  ;;  %v1295_v57 = vld [vmem:[%s5156_s10 + $0x20] sm:$0xff]  ;;  %v1296_v59 = vld [vmem:[%s5156_s10 + $0x28] sm:$0xff]  ;;  %s4126_s18 = scalar_lea.vmem %s5100_s30, 128 }
 0x47f   : > { %v1304_v60 = vld [vmem:[%s5156_s10 + $0x68] sm:$0xff]  ;;  %p4127_p12 = scmp.ne.s32.totalorder %s5100_s30, %s4126_s18  ;;  %p4134_p2 = scmp.lt.s32.totalorder %s4132_s19, %s4126_s18 }
 0x481   : > { %p4128_p13 = pnand %p4127_p12, %p4345_p4  ;;  %p4135_p3 = por %p4134_p2, %p4133_p1 }
 0x483   : > { %p4129_p0 = pneg %p4128_p13 }
 0x485   : > { %p4136_p5 = pnand %p4135_p3, %p4129_p0 }
 0x4e0   : > { %v940_v61 = vpop.permute.xlu0 %939 }
 0x4e1   : > { %943 = vst.msk [vmem:[#allocation3] sm:$0xf] %vm942_vm6, %v940_v61  ;;  %v3469_v61 = vcombine.low %v1309_v49, %v1317_v50  ;;  %v4000_v49 = vld [vmem:[%s5158_s12 + $0x28] sm:$0xff]  }
 0x4e2   : > { %v4001_v50 = vld [vmem:[%s5158_s12 + $0xa8] sm:$0xff]  }
 0x4e8   : > { %v1063_v62 = vpop.permute.xlu1 %1062 }
 0x4e9   : > { %1066 = vst.msk [vmem:[#allocation3] sm:$0xf] %vm1065_vm7, %v1063_v62  ;;  %v3471_v62 = vcombine.low %v1310_v51, %v1318_v52  ;;  %v4002_v51 = vld [vmem:[%s5158_s12 + $0x70] sm:$0xff]  }
 0x4ea   : > { %v4003_v52 = vld [vmem:[%s5158_s12 + $0xf0] sm:$0xff]  }
 0x4f0   : > { %v1186_v1 = vpop.permute.xlu0 %1185 }
 0x4f1   : > { %1189 = vst.msk [vmem:[#allocation3] sm:$0xf] %vm1188_vm8, %v1186_v1  ;;  %v3458_v1 = vcombine.high %v1295_v57, %v1303_v58 }
 0x4f8   : > { %v1190_v63 = vld [vmem:[#allocation3] sm:$0xf] }
 0x4f9   : > { %3897 = vmatmul.mubr.msk.bf16.vlgmr.msra.gmra.mrb[20].mxu0 %vm588_vm1, %v1190_v63  ;;  %v3460_v63 = vcombine.high %v1296_v59, %v1304_v60 }
 0x4fa   : > { %1643 = vmatprep.mubr.bf16.mxu0 %v4218_v30 }
 0x5cc   : > { %v1251_v2 = vpop.f32.mrb[20].mxu0 }
 0x5cd   : > { %v1252_v3 = vadd.f32 %v3443_v0, %v1251_v2  ;;  %v3898_v4 = vpop.f32.mrb[21].mxu0  ;;  %v1311_v0 = vld [vmem:[%s5156_s10 + $0xa0] sm:$0xff] }
 0x5ce   : > { %v1254_v5 = vpop.f32.mrb[22].mxu0  ;;  %v1319_v2 = vld [vmem:[%s5156_s10 + $0xe0] sm:$0xff]  ;;  %v1320_v4 = vld [vmem:[%s5156_s10 + $0xe8] sm:$0xff] }
 0x5cf   : > { %v1257_v7 = vadd.f32 %v1252_v3, %v4389_v6  ;;  %v3899_v8 = vpop.f32.mrb[23].mxu0  ;;  %v1292_v6 = vld [vmem:[%s5156_s10 + $0x8] sm:$0xff]  ;;  %v3457_v5 = vcombine.low %v1295_v57, %v1303_v58  ;;  %v4007_v57 = vld [vmem:[%s5158_s12 + $0xf8] sm:$0xff]  }
 0x5d0   : > { %v3451_v17 = vcombine.low %v1292_v6, %v1300_v15  ;;  %v3452_v18 = vcombine.high %v1292_v6, %v1300_v15  ;;  %v1312_v3 = vld [vmem:[%s5156_s10 + $0xa8] sm:$0xff]  ;;  %v3474_v8 = vcombine.high %v1311_v0, %v1319_v2  ;;  %v3473_v6 = vcombine.low %v1311_v0, %v1319_v2  ;;  %v4008_v58 = vld [vmem:[%s5158_s12 + $0x38] sm:$0xff]  }
 0x5d1   : > { %v1260_v9 = vsel %vm588_vm1, %v1257_v7, 0.0  ;;  %v1265_v10 = vmul.f32 %v1257_v7, %v1257_v7  ;;  %v3475_v14 = vcombine.low %v1312_v3, %v1320_v4  ;;  %v4722_v0 = vld [vmem:[%s5157_s11 + $0x8] sm:$0xff] }
 0x5d2   : > { %1261 = vadd.xlane.f32.xlu1 %v1260_v9  ;;  %1611 = vmatprep.subr.bf16.mxu0 %v3452_v18  ;;  %v3476_v9 = vcombine.high %v1312_v3, %v1320_v4  ;;  %v1321_v18 = vld [vmem:[%s5156_s10 + $0xf0] sm:$0xff] }
 0x5d3   : > { %v1266_v11 = vsel %vm588_vm1, %v1265_v10, 0.0  ;;  %1612 = vmatpush1.bf16.msra.mxu0 %v3451_v17  ;;  %v1297_v10 = vld [vmem:[%s5156_s10 + $0x30] sm:$0xff] }
 0x5d4   : > { %1267 = vadd.xlane.f32.xlu0 %v1266_v11  ;;  %1613 = vmatprep.subr.bf16.mxu0 %v3468_v27  ;;  %v1305_v11 = vld [vmem:[%s5156_s10 + $0x70] sm:$0xff]  ;;  %v3479_v27 = vcombine.low %v1314_v19, %v1322_v20 }
 0x5d5   : > { %v3462_v15 = vcombine.high %v1297_v10, %v1305_v11  ;;  %v1313_v17 = vld [vmem:[%s5156_s10 + $0xb0] sm:$0xff]  ;;  %v3461_v21 = vcombine.low %v1297_v10, %v1305_v11 }
 0x5d6   : > { %v3478_v23 = vcombine.high %v1313_v17, %v1321_v18 }
 0x5d7   : > { %1614 = vmatpush1.bf16.msra.mxu0 %v3467_v26  ;;  %v3477_v26 = vcombine.low %v1313_v17, %v1321_v18 }
 0x5d8   : > { %1693 = vmatprep.subr.bf16.mxu0 %v3456_v35  ;;  %v3986_v35 = vld [vmem:[%s5158_s12 + $0x50] sm:$0xff]  }
 0x65f   : > { %v1262_v36 = vpop.xlane.xlu1 %1261 }
 0x660   : > { %v1264_v37 = vmul.f32 0.03125, %v1262_v36  ;;  %v3987_v36 = vld [vmem:[%s5158_s12 + $0xd0] sm:$0xff]  }
 0x661   : > { %v1268_v38 = vpop.xlane.xlu0 %1267 }
 0x662   : > { %v1270_v39 = vmul.f32 %v1264_v37, %v1264_v37  ;;  %v1269_v40 = vmul.f32 0.03125, %v1268_v38  ;;  %v1274_v43 = vsub.f32 %v1257_v7, %v1264_v37  ;;  %v3459_v7 = vcombine.low %v1296_v59, %v1304_v60  ;;  %v3988_v37 = vld [vmem:[%s5158_s12 + $0x10] sm:$0xff]   ;;  %v4009_v59 = vld [vmem:[%s5158_s12 + $0xb8] sm:$0xff]   ;;  %v4010_v60 = vld [vmem:[%s5158_s12 + $0x140] sm:$0xff]  }
 0x663   : > { %v3989_v38 = vld [vmem:[%s5158_s12 + $0x90] sm:$0xff]  }
 0x664   : > { %v1271_v41 = vsub.f32 %v1269_v40, %v1270_v39  ;;  %v3990_v39 = vld [vmem:[%s5158_s12 + $0x58] sm:$0xff]  }
 0x665   : > { %v3991_v40 = vld [vmem:[%s5158_s12 + $0xd8] sm:$0xff]  }
 0x666   : > { %v1272_v42 = vadd.f32 1e-05, %v1271_v41  ;;  %v3992_v41 = vld [vmem:[%s5158_s12 + $0x18] sm:$0xff]  }
 0x668   : > { %4122 = vrsqrt.f32 %v1272_v42  ;;  %v3993_v42 = vld [vmem:[%s5158_s12 + $0x98] sm:$0xff]  }
 0x672   : > { %v4123_v44 = vpop.eup %4122 }
 0x673   : > { %v1275_v46 = vmul.f32 %v4123_v44, %v1274_v43  ;;  %v3994_v43 = vld [vmem:[%s5158_s12 + $0x60] sm:$0xff]  }
 0x674   : > { %v3995_v44 = vld [vmem:[%s5158_s12 + $0xe0] sm:$0xff]  }
 0x675   : > { %v1282_v48 = vmul.f32 %v3447_v45, %v1275_v46  ;;  %v3996_v45 = vld [vmem:[%s5158_s12 + $0x20] sm:$0xff]  }
 0x676   : > { %v3997_v46 = vld [vmem:[%s5158_s12 + $0xa0] sm:$0xff]  }
 0x677   : > { %v4538_v53 = vadd.f32 %v3448_v47, %v1282_v48  ;;  %v3998_v47 = vld [vmem:[%s5158_s12 + $0x68] sm:$0xff]  }
 0x678   : > { %v3999_v48 = vld [vmem:[%s5158_s12 + $0xe8] sm:$0xff]  }
 0x679   : > { %v4542_v54 = vpack.c.bf16 %v4538_v53, %v4538_v53 }
 0x67b   : > { %3481 = vmatmul.mubr.msk.bf16.vlgmr.msra.gmra.mrb[20].mxu1 %vm588_vm1, %v4542_v54  ;;  %3482 = vmatmul.mubr.msk.bf16.vlgmr.msra.gmra.mrb[24].mxu0 %vm588_vm1, %v4542_v54 }
 0x67c   : > { %1653 = vmatpush1.bf16.msra.mxu1 %v3453_v33  ;;  %1694 = vmatpush1.bf16.msra.mxu0 %v3455_v34  ;;  %v3984_v33 = vld [vmem:[%s5158_s12 + $0x8] sm:$0xff]  }
 0x67d   : > { %1654 = vmatprep.subr.bf16.mxu1 %v3470_v55  ;;  %1695 = vmatprep.subr.bf16.mxu0 %v3472_v56  ;;  %v3985_v34 = vld [vmem:[%s5158_s12 + $0x88] sm:$0xff]   ;;  %v4005_v55 = vld [vmem:[%s5158_s12 + $0xb0] sm:$0xff]   ;;  %v4006_v56 = vld [vmem:[%s5158_s12 + $0x78] sm:$0xff]  }
 0x67e   : > { %1684 = vmatprep.mubr.bf16.mxu1 %v4218_v30  ;;  %1725 = vmatprep.mubr.bf16.mxu0 %v4218_v30 }
 0x680   : > { %1655 = vmatpush1.bf16.msra.mxu1 %v3469_v61  ;;  %1696 = vmatpush1.bf16.msra.mxu0 %v3471_v62  ;;  %v4011_v61 = vld [vmem:[%s5158_s12 + $0x1c0] sm:$0xff]   ;;  %v1327_v62 = vlaneseq }
 0x681   : > { %1734 = vmatprep.subr.bf16.mxu1 %v3458_v1  ;;  %1775 = vmatprep.subr.bf16.mxu0 %v3460_v63 }
 0x682   : > { %v4716_v1 = vshrl.u32 %v1327_v62, 7  ;;  %v4021_v62 = vld [vmem:[%s5158_s12 + $0x190] sm:$0xff]  }
 0x683   : > { %3483 = vmatmul.mubr.msk.bf16.vlgmr.msra.gmra.mrb[24].mxu1 %vm588_vm1, %v4542_v54  ;;  %3484 = vmatmul.mubr.msk.bf16.vlgmr.msra.gmra.mrb[28].mxu0 %vm588_vm1, %v4542_v54 }
 0x684   : > { %1735 = vmatpush1.bf16.msra.mxu1 %v3457_v5  ;;  %1776 = vmatpush1.bf16.msra.mxu0 %v3459_v7  ;;  %v1353_v63 = vsub.s32 6, %v4716_v1  ;;  %v1329_v3 = vsub.s32 0, %v4716_v1  ;;  %v1337_v4 = vsub.s32 2, %v4716_v1  ;;  %v4734_v5 = vld [vmem:[%s5157_s11] sm:$0xff]  ;;  %v1333_v7 = vsub.s32 1, %v4716_v1 }
 0x685   : > { %1736 = vmatprep.subr.bf16.mxu1 %v3474_v8  ;;  %1777 = vmatprep.subr.bf16.mxu0 %v3476_v9  ;;  %v1341_v8 = vsub.s32 3, %v4716_v1 }
 0x686   : > { %1766 = vmatprep.mubr.bf16.mxu1 %v4218_v30  ;;  %1807 = vmatprep.mubr.bf16.mxu0 %v4218_v30  ;;  %v4727_v2 = vrot.slane %v4722_v0, %v1353_v63  ;;  %v1330_v9 = vrot.slane %v4734_v5, %v1329_v3  ;;  %v1338_v10 = vrot.slane %v4734_v5, %v1337_v4 }
 0x687   : > { %v1334_v11 = vrot.slane %v4734_v5, %v1333_v7  ;;  %v1342_v12 = vrot.slane %v4734_v5, %v1341_v8 }
 0x688   : > { %1737 = vmatpush1.bf16.msra.mxu1 %v3473_v6  ;;  %1778 = vmatpush1.bf16.msra.mxu0 %v3475_v14 }
 0x689   : > { %1816 = vmatprep.subr.bf16.mxu1 %v3462_v15  ;;  %1857 = vmatprep.subr.bf16.mxu0 %v3464_v16 }
 0x68b   : > { %3485 = vmatmul.mubr.msk.bf16.vlgmr.msra.gmra.mrb[28].mxu1 %vm588_vm1, %v4542_v54  ;;  %3486 = vmatmul.mubr.msk.bf16.vlgmr.msra.gmra.mrb[32].mxu0 %vm588_vm1, %v4542_v54 }
 0x68c   : > { %1817 = vmatpush1.bf16.msra.mxu1 %v3461_v21  ;;  %1858 = vmatpush1.bf16.msra.mxu0 %v3463_v22  ;;  %v1349_v22 = vsub.s32 5, %v4716_v1 }
 0x68d   : > { %1818 = vmatprep.subr.bf16.mxu1 %v3478_v23  ;;  %1859 = vmatprep.subr.bf16.mxu0 %v3480_v25  ;;  %v1357_v23 = vsub.s32 7, %v4716_v1 }
 0x68e   : > { %1848 = vmatprep.mubr.bf16.mxu1 %v4218_v30  ;;  %1889 = vmatprep.mubr.bf16.mxu0 %v4218_v30  ;;  %v3983_v30 = vld [vmem:[%s5158_s12 + $0xc8] sm:$0xff]  }
 0x690   : > { %1819 = vmatpush1.bf16.msra.mxu1 %v3477_v26  ;;  %1860 = vmatpush1.bf16.msra.mxu0 %v3479_v27 }
 0x691   : > { %3652 = vmatprep.subr.bf16.mxu1 %v3978_v28  ;;  %3674 = vmatprep.subr.bf16.mxu0 %v3979_v29 }
 0x693   : > { %3487 = vmatmul.mubr.msk.bf16.vlgmr.msra.gmra.mrb[32].mxu1 %vm588_vm1, %v4542_v54  ;;  %3488 = vmatmul.mubr.msk.bf16.vlgmr.msra.gmra.mrb[36].mxu0 %vm588_vm1, %v4542_v54  ;;  %v4004_v54 = vld [vmem:[%s5158_s12 + $0x30] sm:$0xff]  }
 0x694   : > { %3653 = vmatpush3.bf16.msra.mxu1 %v3980_v24  ;;  %3675 = vmatpush3.bf16.msra.mxu0 %v3981_v31 }
 0x695   : > { %3654 = vmatprep.subr.bf16.mxu1 %v3982_v32  ;;  %3676 = vmatprep.subr.bf16.mxu0 %v3983_v30  ;;  %v1350_v30 = vrot.slane %v4734_v5, %v1349_v22 }
 0x698   : > { %3655 = vmatpush3.bf16.msra.mxu1 %v3984_v33  ;;  %3677 = vmatpush3.bf16.msra.mxu0 %v3985_v34  ;;  %v1358_v33 = vrot.slane %v4734_v5, %v1357_v23  ;;  %v4012_v34 = vld [vmem:[%s5158_s12 + $0x100] sm:$0xff]  }
 0x699   : > { %3656 = vmatprep.subr.bf16.mxu1 %v3986_v35  ;;  %3678 = vmatprep.subr.bf16.mxu0 %v3987_v36  ;;  %v4013_v35 = vld [vmem:[%s5158_s12 + $0x180] sm:$0xff]  }
 0x69c   : > { %3657 = vmatpush3.bf16.msra.mxu1 %v3988_v37  ;;  %3679 = vmatpush3.bf16.msra.mxu0 %v3989_v38  ;;  %v4014_v38 = vld [vmem:[%s5158_s12 + $0x148] sm:$0xff]  }
 0x69d   : > { %3658 = vmatprep.subr.bf16.mxu1 %v3990_v39  ;;  %3680 = vmatprep.subr.bf16.mxu0 %v3991_v40  ;;  %v4015_v39 = vld [vmem:[%s5158_s12 + $0x1c8] sm:$0xff]  }
 0x6a0   : > { %3659 = vmatpush3.bf16.msra.mxu1 %v3992_v41  ;;  %3681 = vmatpush3.bf16.msra.mxu0 %v3993_v42 }
 0x6a1   : > { %3660 = vmatprep.subr.bf16.mxu1 %v3994_v43  ;;  %3682 = vmatprep.subr.bf16.mxu0 %v3995_v44 }
 0x6a4   : > { %3661 = vmatpush3.bf16.msra.mxu1 %v3996_v45  ;;  %3683 = vmatpush3.bf16.msra.mxu0 %v3997_v46 }
 0x6a5   : > { %3662 = vmatprep.subr.bf16.mxu1 %v3998_v47  ;;  %3684 = vmatprep.subr.bf16.mxu0 %v3999_v48  ;;  %v4016_v48 = vld [vmem:[%s5158_s12 + $0x108] sm:$0xff]  }
 0x6a8   : > { %3663 = vmatpush3.bf16.msra.mxu1 %v4000_v49  ;;  %3685 = vmatpush3.bf16.msra.mxu0 %v4001_v50  ;;  %v4017_v49 = vld [vmem:[%s5158_s12 + $0x188] sm:$0xff]  }
 0x6a9   : > { %3664 = vmatprep.subr.bf16.mxu1 %v4002_v51  ;;  %3686 = vmatprep.subr.bf16.mxu0 %v4003_v52  ;;  %v4018_v52 = vld [vmem:[%s5158_s12 + $0x150] sm:$0xff]  }
 0x6ac   : > { %3665 = vmatpush3.bf16.msra.mxu1 %v4004_v54  ;;  %3687 = vmatpush3.bf16.msra.mxu0 %v4005_v55  ;;  %v4019_v54 = vld [vmem:[%s5158_s12 + $0x1d0] sm:$0xff]  }
 0x6ad   : > { %3666 = vmatprep.subr.bf16.mxu1 %v4006_v56  ;;  %3688 = vmatprep.subr.bf16.mxu0 %v4007_v57  ;;  %v1362_v57 = vrot.slane %v4722_v0, %v1329_v3  ;;  %v4022_v3 = vld [vmem:[%s5158_s12 + $0x158] sm:$0xff]  }
 0x6b0   : > { %3667 = vmatpush3.bf16.msra.mxu1 %v4008_v58  ;;  %3689 = vmatpush3.bf16.msra.mxu0 %v4009_v59  ;;  %v1370_v58 = vrot.slane %v4722_v0, %v1337_v4  ;;  %v4023_v4 = vld [vmem:[%s5158_s12 + $0x1d8] sm:$0xff]  }
 0x6b1   : > { %3696 = vmatprep.subr.bf16.mxu1 %v4010_v60  ;;  %3718 = vmatprep.subr.bf16.mxu0 %v4011_v61  ;;  %v4020_v61 = vld [vmem:[%s5158_s12 + $0x110] sm:$0xff]  }
 0x74e   : > { %v1604_v13 = vpop.f32.mrb[20].mxu1  ;;  %v1645_v6 = vpop.f32.mrb[24].mxu0 }
 0x74f   : > { %v1605_v14 = vadd.f32 %v1604_v13, %v1330_v9  ;;  %v1646_v15 = vadd.f32 %v1645_v6, %v1338_v10  ;;  %v1606_v16 = vpop.f32.mrb[21].mxu1  ;;  %v1647_v17 = vpop.f32.mrb[25].mxu0 }
 0x750   : > { %v1607_v18 = vadd.f32 %v1606_v16, %v1334_v11  ;;  %v1648_v19 = vadd.f32 %v1647_v17, %v1342_v12  ;;  %v1608_v20 = vpop.f32.mrb[22].mxu1  ;;  %v1649_v21 = vpop.f32.mrb[26].mxu0  ;;  %v4024_v16 = vld [vmem:[%s5158_s12 + $0x118] sm:$0xff]  }
 0x751   : > { %v1898_v25 = vmax.f32 %v1605_v14, 0.0  ;;  %v1900_v26 = vmax.f32 %v1646_v15, 0.0  ;;  %v1609_v27 = vpop.f32.mrb[23].mxu1  ;;  %v1650_v28 = vpop.f32.mrb[27].mxu0  ;;  %v4025_v17 = vld [vmem:[%s5158_s12 + $0x198] sm:$0xff]   ;;  %v4026_v21 = vld [vmem:[%s5158_s12 + $0x160] sm:$0xff]  }
 0x752   : > { %v1899_v29 = vmax.f32 %v1607_v18, 0.0  ;;  %v1901_v24 = vmax.f32 %v1648_v19, 0.0  ;;  %v1345_v18 = vsub.s32 4, %v4716_v1  ;;  %v4028_v27 = vld [vmem:[%s5158_s12 + $0x120] sm:$0xff]   ;;  %v4071_v1 = vld [vmem:[%s5158_s12 + $0x2f8] sm:$0xff]  }
 0x753   : > { %v1914_v36 = vpack.c.bf16 %v1898_v25, %v1898_v25  ;;  %v1916_v37 = vpack.c.bf16 %v1900_v26, %v1900_v26  ;;  %v4027_v25 = vld [vmem:[%s5158_s12 + $0x1e0] sm:$0xff]  }
 0x754   : > { %v1915_v31 = vpack.c.bf16 %v1899_v29, %v1899_v29  ;;  %v1917_v32 = vpack.c.bf16 %v1901_v24, %v1901_v24  ;;  %v1378_v26 = vrot.slane %v4722_v0, %v1345_v18  ;;  %v4029_v28 = vld [vmem:[%s5158_s12 + $0x1a0] sm:$0xff]   ;;  %v4030_v29 = vld [vmem:[%s5158_s12 + $0x168] sm:$0xff]  }
 0x755   : > { %v4031_v24 = vld [vmem:[%s5158_s12 + $0x1e8] sm:$0xff]  }
 0x756   : > { %v4766_v40 = vpop.f32.mrb[24].mxu1  ;;  %v4768_v41 = vpop.f32.mrb[28].mxu0  ;;  %2993 = vmatprep.mubr.bf16.mxu1 %v1915_v31  ;;  %3033 = vmatprep.mubr.bf16.mxu0 %v1917_v32 }
 0x757   : > { %v1688_v42 = vpop.f32.mrb[25].mxu1  ;;  %v1729_v43 = vpop.f32.mrb[29].mxu0  ;;  %2994 = vmatmul.mubr.bf16.vlgmr.msra.gmra.mrb[36].mxu1 %v1914_v36  ;;  %3034 = vmatmul.mubr.bf16.vlgmr.msra.gmra.mrb[40].mxu0 %v1916_v37 }
 0x758   : > { %v1689_v44 = vadd.f32 %v1688_v42, %v1350_v30  ;;  %v1730_v45 = vadd.f32 %v1729_v43, %v1358_v33  ;;  %3697 = vmatpush3.bf16.msra.mxu1 %v4012_v34  ;;  %3719 = vmatpush3.bf16.msra.mxu0 %v4013_v35  ;;  %v1690_v46 = vpop.f32.mrb[26].mxu1  ;;  %v1731_v47 = vpop.f32.mrb[30].mxu0  ;;  %v1346_v42 = vrot.slane %v4734_v5, %v1345_v18  ;;  %v4053_v18 = vld [vmem:[%s5158_s12 + $0x290] sm:$0xff]  }
 0x759   : > { %v1691_v50 = vpop.f32.mrb[27].mxu1  ;;  %v1732_v51 = vpop.f32.mrb[31].mxu0  ;;  %3698 = vmatprep.subr.bf16.mxu1 %v4014_v38  ;;  %3720 = vmatprep.subr.bf16.mxu0 %v4015_v39  ;;  %v4032_v38 = vld [vmem:[%s5158_s12 + $0x128] sm:$0xff]   ;;  %v4035_v46 = vld [vmem:[%s5158_s12 + $0x1f0] sm:$0xff]   ;;  %v1366_v47 = vrot.slane %v4722_v0, %v1333_v7  ;;  %v4038_v7 = vld [vmem:[%s5158_s12 + $0x178] sm:$0xff]  }
 0x75a   : > { %v1903_v55 = vmax.f32 %v1689_v44, 0.0  ;;  %v1905_v56 = vmax.f32 %v1730_v45, 0.0  ;;  %v4033_v39 = vld [vmem:[%s5158_s12 + $0x1a8] sm:$0xff]   ;;  %v4034_v45 = vld [vmem:[%s5158_s12 + $0x170] sm:$0xff]  }
 0x75c   : > { %v1919_v59 = vpack.c.bf16 %v1903_v55, %v1903_v55  ;;  %v1921_v60 = vpack.c.bf16 %v1905_v56, %v1905_v56  ;;  %3699 = vmatpush3.bf16.msra.mxu1 %v4016_v48  ;;  %3721 = vmatpush3.bf16.msra.mxu0 %v4017_v49  ;;  %v4037_v48 = vld [vmem:[%s5158_s12 + $0x1b0] sm:$0xff]   ;;  %v1687_v49 = vadd.f32 %v4766_v40, %v1346_v42  ;;  %v4040_v40 = vld [vmem:[%s5158_s12 + $0x138] sm:$0xff]   ;;  %v4042_v56 = vld [vmem:[%s5158_s12 + $0x240] sm:$0xff]  }
 0x75d   : > { %3700 = vmatprep.subr.bf16.mxu1 %v4018_v52  ;;  %3722 = vmatprep.subr.bf16.mxu0 %v4019_v54  ;;  %v1390_v42 = vrot.slane %v4722_v0, %v1357_v23  ;;  %v4072_v23 = vld [vmem:[%s5158_s12 + $0x238] sm:$0xff]  }
 0x75e   : > { %v1768_v9 = vpop.f32.mrb[28].mxu1  ;;  %v1809_v10 = vpop.f32.mrb[32].mxu0  ;;  %3073 = vmatprep.mubr.bf16.mxu1 %v1919_v59  ;;  %3113 = vmatprep.mubr.bf16.mxu0 %v1921_v60  ;;  %v1902_v54 = vmax.f32 %v1687_v49, 0.0  ;;  %v4044_v60 = vld [vmem:[%s5158_s12 + $0x200] sm:$0xff]  }
 0x75f   : > { %v4796_v11 = vadd.f32 %v1768_v9, %v1362_v57  ;;  %v4798_v12 = vadd.f32 %v1809_v10, %v1370_v58  ;;  %v1770_v13 = vpop.f32.mrb[29].mxu1  ;;  %v1811_v6 = vpop.f32.mrb[33].mxu0  ;;  %v4043_v57 = vld [vmem:[%s5158_s12 + $0x2c0] sm:$0xff]   ;;  %v4046_v9 = vld [vmem:[%s5158_s12 + $0x248] sm:$0xff]  }
 0x760   : > { %3701 = vmatpush3.bf16.msra.mxu1 %v4020_v61  ;;  %3723 = vmatpush3.bf16.msra.mxu0 %v4021_v62  ;;  %v1772_v14 = vpop.f32.mrb[30].mxu1  ;;  %v1813_v15 = vpop.f32.mrb[34].mxu0  ;;  %v1771_v51 = vadd.f32 %v1770_v13, %v1366_v47  ;;  %v1918_v61 = vpack.c.bf16 %v1902_v54, %v1902_v54  ;;  %v4047_v10 = vld [vmem:[%s5158_s12 + $0x2c8] sm:$0xff]   ;;  %v4074_v47 = vld [vmem:[%s5158_s12 + $0x340] sm:$0xff]   ;;  %v4083_v54 = vld [vmem:[%s5158_s12 + $0x3d0] sm:$0xff]  }
 0x761   : > { %v1773_v19 = vpop.f32.mrb[31].mxu1  ;;  %v1814_v20 = vpop.f32.mrb[35].mxu0  ;;  %3702 = vmatprep.subr.bf16.mxu1 %v4022_v3  ;;  %3724 = vmatprep.subr.bf16.mxu0 %v4023_v4  ;;  %v4045_v3 = vld [vmem:[%s5158_s12 + $0x280] sm:$0xff]   ;;  %v4049_v14 = vld [vmem:[%s5158_s12 + $0x288] sm:$0xff]   ;;  %v4050_v15 = vld [vmem:[%s5158_s12 + $0x250] sm:$0xff]  }
 0x762   : > { %v1907_v58 = vmax.f32 %v1771_v51, 0.0  ;;  %v4054_v19 = vld [vmem:[%s5158_s12 + $0x258] sm:$0xff]   ;;  %v4077_v49 = vld [vmem:[%s5158_s12 + $0x380] sm:$0xff]  }
 0x763   : > { %v4055_v20 = vld [vmem:[%s5158_s12 + $0x2d8] sm:$0xff]  }
 0x764   : > { %3703 = vmatpush3.bf16.msra.mxu1 %v4024_v16  ;;  %3725 = vmatpush3.bf16.msra.mxu0 %v4025_v17  ;;  %v1923_v4 = vpack.c.bf16 %v1907_v58, %v1907_v58  ;;  %v4051_v16 = vld [vmem:[%s5158_s12 + $0x2d0] sm:$0xff]   ;;  %v4087_v58 = vld [vmem:[%s5158_s12 + $0x3d8] sm:$0xff]  }
 0x765   : > { %3704 = vmatprep.subr.bf16.mxu1 %v4026_v21  ;;  %3726 = vmatprep.subr.bf16.mxu0 %v4027_v25  ;;  %v4052_v17 = vld [vmem:[%s5158_s12 + $0x210] sm:$0xff]   ;;  %v4056_v21 = vld [vmem:[%s5158_s12 + $0x218] sm:$0xff]  }
 0x766   : > { %v1850_v31 = vpop.f32.mrb[32].mxu1  ;;  %v1891_v32 = vpop.f32.mrb[36].mxu0  ;;  %v4057_v25 = vld [vmem:[%s5158_s12 + $0x298] sm:$0xff]  }
 0x767   : > { %v4826_v30 = vadd.f32 %v1850_v31, %v1378_v26  ;;  %v4829_v33 = vadd.f32 %v1891_v32, %v4727_v2  ;;  %v4831_v34 = vpop.f32.mrb[33].mxu1  ;;  %v4833_v35 = vpop.f32.mrb[37].mxu0  ;;  %v1354_v2 = vrot.slane %v4734_v5, %v1353_v63  ;;  %v1374_v63 = vrot.slane %v4722_v0, %v1341_v8  ;;  %v4036_v5 = vld [vmem:[%s5158_s12 + $0x130] sm:$0xff]   ;;  %v4039_v8 = vld [vmem:[%s5158_s12 + $0x1f8] sm:$0xff]   ;;  %v4058_v26 = vld [vmem:[%s5158_s12 + $0x260] sm:$0xff]  }
 0x768   : > { %3705 = vmatpush3.bf16.msra.mxu1 %v4028_v27  ;;  %3727 = vmatpush3.bf16.msra.mxu0 %v4029_v28  ;;  %v1854_v36 = vpop.f32.mrb[34].mxu1  ;;  %v1895_v37 = vpop.f32.mrb[38].mxu0  ;;  %v4059_v27 = vld [vmem:[%s5158_s12 + $0x2e0] sm:$0xff]   ;;  %v4063_v31 = vld [vmem:[%s5158_s12 + $0x2e8] sm:$0xff]  }
 0x769   : > { %v1855_v43 = vpop.f32.mrb[35].mxu1  ;;  %v1896_v44 = vpop.f32.mrb[39].mxu0  ;;  %3706 = vmatprep.subr.bf16.mxu1 %v4030_v29  ;;  %3728 = vmatprep.subr.bf16.mxu0 %v4031_v24  ;;  %v1728_v50 = vadd.f32 %v4768_v41, %v1354_v2  ;;  %v1812_v52 = vadd.f32 %v1811_v6, %v1374_v63  ;;  %v4041_v41 = vld [vmem:[%s5158_s12 + $0x1b8] sm:$0xff]   ;;  %v4048_v6 = vld [vmem:[%s5158_s12 + $0x208] sm:$0xff]   ;;  %v4060_v28 = vld [vmem:[%s5158_s12 + $0x220] sm:$0xff]  }
 0x76a   : > { %v4061_v29 = vld [vmem:[%s5158_s12 + $0x2a0] sm:$0xff]   ;;  %v4062_v24 = vld [vmem:[%s5158_s12 + $0x268] sm:$0xff]   ;;  %v4066_v37 = vld [vmem:[%s5158_s12 + $0x270] sm:$0xff]  }
 0x76b   : > { %v1904_v55 = vmax.f32 %v1728_v50, 0.0  ;;  %v1909_v59 = vmax.f32 %v1812_v52, 0.0  ;;  %v4064_v32 = vld [vmem:[%s5158_s12 + $0x228] sm:$0xff]   ;;  %v4068_v2 = vld [vmem:[%s5158_s12 + $0x230] sm:$0xff]   ;;  %v4070_v44 = vld [vmem:[%s5158_s12 + $0x278] sm:$0xff]  }
 0x76c   : > { %3707 = vmatpush3.bf16.msra.mxu1 %v4032_v38  ;;  %3729 = vmatpush3.bf16.msra.mxu0 %v4033_v39  ;;  %v4065_v36 = vld [vmem:[%s5158_s12 + $0x2a8] sm:$0xff]   ;;  %v4067_v38 = vld [vmem:[%s5158_s12 + $0x2f0] sm:$0xff]   ;;  %v1382_v39 = vrot.slane %v4722_v0, %v1349_v22  ;;  %v1894_v22 = vadd.f32 %v4833_v35, %v1390_v42  ;;  %v4075_v35 = vld [vmem:[%s5158_s12 + $0x3c0] sm:$0xff]  }
 0x76d   : > { %3708 = vmatprep.subr.bf16.mxu1 %v4034_v45  ;;  %3730 = vmatprep.subr.bf16.mxu0 %v4035_v46  ;;  %v1920_v62 = vpack.c.bf16 %v1904_v55, %v1904_v55  ;;  %v1925_v13 = vpack.c.bf16 %v1909_v59, %v1909_v59  ;;  %v4069_v43 = vld [vmem:[%s5158_s12 + $0x2b0] sm:$0xff]   ;;  %v1906_v45 = vmax.f32 %v4796_v11, 0.0  ;;  %v4073_v46 = vld [vmem:[%s5158_s12 + $0x2b8] sm:$0xff]   ;;  %v4076_v11 = vld [vmem:[%s5158_s12 + $0x300] sm:$0xff]  }
 0x76e   : > { %v1853_v0 = vadd.f32 %v4831_v34, %v1382_v39  ;;  %v1908_v34 = vmax.f32 %v4798_v12, 0.0  ;;  %v4078_v50 = vld [vmem:[%s5158_s12 + $0x348] sm:$0xff]   ;;  %v4084_v55 = vld [vmem:[%s5158_s12 + $0x310] sm:$0xff]   ;;  %v4088_v59 = vld [vmem:[%s5158_s12 + $0x318] sm:$0xff]  }
 0x76f   : > { %v4080_v52 = vld [vmem:[%s5158_s12 + $0x308] sm:$0xff]  }
 0x770   : > { %3709 = vmatpush3.bf16.msra.mxu1 %v4036_v5  ;;  %3731 = vmatpush3.bf16.msra.mxu0 %v4037_v48  ;;  %v1911_v63 = vmax.f32 %v1853_v0, 0.0  ;;  %v1913_v5 = vmax.f32 %v1894_v22, 0.0  ;;  %v1922_v48 = vpack.c.bf16 %v1906_v45, %v1906_v45  ;;  %v1924_v12 = vpack.c.bf16 %v1908_v34, %v1908_v34 }
 0x771   : > { %3710 = vmatprep.subr.bf16.mxu1 %v4038_v7  ;;  %3732 = vmatprep.subr.bf16.mxu0 %v4039_v8  ;;  %v4079_v8 = vld [vmem:[%s5158_s12 + $0x3c8] sm:$0xff]  }
 0x772   : > { %v1927_v7 = vpack.c.bf16 %v1911_v63, %v1911_v63  ;;  %v1929_v51 = vpack.c.bf16 %v1913_v5, %v1913_v5 }
 0x774   : > { %3711 = vmatpush3.bf16.msra.mxu1 %v4040_v40  ;;  %3733 = vmatpush3.bf16.msra.mxu0 %v4041_v41  ;;  %v4081_v40 = vld [vmem:[%s5158_s12 + $0x388] sm:$0xff]   ;;  %v4082_v41 = vld [vmem:[%s5158_s12 + $0x350] sm:$0xff]  }
 0x775   : > { %3740 = vmatprep.subr.bf16.mxu1 %v4042_v56  ;;  %3762 = vmatprep.subr.bf16.mxu0 %v4043_v57  ;;  %v4085_v56 = vld [vmem:[%s5158_s12 + $0x390] sm:$0xff]   ;;  %v4086_v57 = vld [vmem:[%s5158_s12 + $0x358] sm:$0xff]  }
 0x777   : > { %3074 = vmatmul.mubr.bf16.vlgmr.msra.gmra.mrb[40].mxu1 %v1918_v61  ;;  %3114 = vmatmul.mubr.bf16.vlgmr.msra.gmra.mrb[44].mxu0 %v1920_v62  ;;  %v4090_v61 = vld [vmem:[%s5158_s12 + $0x360] sm:$0xff]  }
 0x778   : > { %3741 = vmatpush3.bf16.msra.mxu1 %v4044_v60  ;;  %3153 = vmatprep.mubr.bf16.mxu1 %v1923_v4  ;;  %v4089_v60 = vld [vmem:[%s5158_s12 + $0x398] sm:$0xff]   ;;  %v4091_v62 = vld [vmem:[%s5158_s12 + $0x3e0] sm:$0xff]  }
 0x779   : > { %3763 = vmatpush3.bf16.msra.mxu0 %v4045_v3  ;;  %3193 = vmatprep.mubr.bf16.mxu0 %v1925_v13  ;;  %v4092_v3 = vld [vmem:[%s5158_s12 + $0x320] sm:$0xff]   ;;  %v4096_v13 = vld [vmem:[%s5158_s12 + $0x328] sm:$0xff]  }
 0x77a   : > { %3742 = vmatprep.subr.bf16.mxu1 %v4046_v9  ;;  %3764 = vmatprep.subr.bf16.mxu0 %v4047_v10  ;;  %v4093_v4 = vld [vmem:[%s5158_s12 + $0x3a0] sm:$0xff]   ;;  %v4094_v9 = vld [vmem:[%s5158_s12 + $0x368] sm:$0xff]  }
 0x77b   : > { %v4095_v10 = vld [vmem:[%s5158_s12 + $0x3e8] sm:$0xff]  }
 0x77c   : > { %3743 = vmatpush3.bf16.msra.mxu1 %v4048_v6  ;;  %v4097_v6 = vld [vmem:[%s5158_s12 + $0x3a8] sm:$0xff]  }
 0x77d   : > { %3765 = vmatpush3.bf16.msra.mxu0 %v4049_v14  ;;  %3744 = vmatprep.subr.bf16.mxu1 %v4050_v15  ;;  %v4098_v14 = vld [vmem:[%s5158_s12 + $0x370] sm:$0xff]  }
 0x77e   : > { %3766 = vmatprep.subr.bf16.mxu0 %v4051_v16  ;;  %v4099_v15 = vld [vmem:[%s5158_s12 + $0x3f0] sm:$0xff]  }
 0x77f   : > { %v4100_v16 = vld [vmem:[%s5158_s12 + $0x330] sm:$0xff]  }
 0x780   : > { %3745 = vmatpush3.bf16.msra.mxu1 %v4052_v17  ;;  %v4101_v17 = vld [vmem:[%s5158_s12 + $0x3b0] sm:$0xff]  }
 0x781   : > { %3767 = vmatpush3.bf16.msra.mxu0 %v4053_v18  ;;  %3746 = vmatprep.subr.bf16.mxu1 %v4054_v19  ;;  %v4102_v18 = vld [vmem:[%s5158_s12 + $0x378] sm:$0xff]  }
 0x782   : > { %3768 = vmatprep.subr.bf16.mxu0 %v4055_v20  ;;  %v4103_v19 = vld [vmem:[%s5158_s12 + $0x3f8] sm:$0xff]  }
 0x783   : > { %v4104_v20 = vld [vmem:[%s5158_s12 + $0x338] sm:$0xff]  }
 0x784   : > { %3747 = vmatpush3.bf16.msra.mxu1 %v4056_v21  ;;  %v1910_v21 = vmax.f32 %v4826_v30, 0.0  ;;  %v3489_v30 = vld [vmem:[%s5159_s13] ss:$0 sm:$0xff] }
 0x785   : > { %3769 = vmatpush3.bf16.msra.mxu0 %v4057_v25  ;;  %3748 = vmatprep.subr.bf16.mxu1 %v4058_v26  ;;  %v4105_v25 = vld [vmem:[%s5158_s12 + $0x3b8] sm:$0xff]   ;;  %v1912_v26 = vmax.f32 %v4829_v33, 0.0 }
 0x786   : > { %3770 = vmatprep.subr.bf16.mxu0 %v4059_v27  ;;  %v1926_v27 = vpack.c.bf16 %v1910_v21, %v1910_v21 }
 0x788   : > { %3749 = vmatpush3.bf16.msra.mxu1 %v4060_v28  ;;  %v1928_v28 = vpack.c.bf16 %v1912_v26, %v1912_v26 }
 0x789   : > { %3771 = vmatpush3.bf16.msra.mxu0 %v4061_v29  ;;  %3750 = vmatprep.subr.bf16.mxu1 %v4062_v24 }
 0x78a   : > { %3772 = vmatprep.subr.bf16.mxu0 %v4063_v31 }
 0x78c   : > { %3751 = vmatpush3.bf16.msra.mxu1 %v4064_v32 }
 0x78d   : > { %3773 = vmatpush3.bf16.msra.mxu0 %v4065_v36  ;;  %3752 = vmatprep.subr.bf16.mxu1 %v4066_v37 }
 0x78e   : > { %3774 = vmatprep.subr.bf16.mxu0 %v4067_v38 }
 0x790   : > { %3753 = vmatpush3.bf16.msra.mxu1 %v4068_v2 }
 0x791   : > { %3775 = vmatpush3.bf16.msra.mxu0 %v4069_v43  ;;  %3754 = vmatprep.subr.bf16.mxu1 %v4070_v44 }
 0x792   : > { %3776 = vmatprep.subr.bf16.mxu0 %v4071_v1 }
 0x794   : > { %3755 = vmatpush3.bf16.msra.mxu1 %v4072_v23 }
 0x795   : > { %3777 = vmatpush3.bf16.msra.mxu0 %v4073_v46  ;;  %3784 = vmatprep.subr.bf16.mxu1 %v4074_v47 }
 0x796   : > { %3806 = vmatprep.subr.bf16.mxu0 %v4075_v35 }
 0x797   : > { %3154 = vmatmul.mubr.bf16.vlgmr.msra.gmra.mrb[44].mxu1 %v1922_v48 }
 0x798   : > { %3194 = vmatmul.mubr.bf16.vlgmr.msra.gmra.mrb[48].mxu0 %v1924_v12  ;;  %3785 = vmatpush3.bf16.msra.mxu1 %v4076_v11 }
 0x799   : > { %3233 = vmatprep.mubr.bf16.mxu1 %v1927_v7  ;;  %3807 = vmatpush3.bf16.msra.mxu0 %v4077_v49 }
 0x79a   : > { %3273 = vmatprep.mubr.bf16.mxu0 %v1929_v51  ;;  %3786 = vmatprep.subr.bf16.mxu1 %v4078_v50 }
 0x79b   : > { %3808 = vmatprep.subr.bf16.mxu0 %v4079_v8 }
 0x79c   : > { %3787 = vmatpush3.bf16.msra.mxu1 %v4080_v52 }
 0x79d   : > { %3809 = vmatpush3.bf16.msra.mxu0 %v4081_v40  ;;  %3788 = vmatprep.subr.bf16.mxu1 %v4082_v41 }
 0x79e   : > { %3810 = vmatprep.subr.bf16.mxu0 %v4083_v54 }
 0x7a0   : > { %3789 = vmatpush3.bf16.msra.mxu1 %v4084_v55 }
 0x7a1   : > { %3811 = vmatpush3.bf16.msra.mxu0 %v4085_v56  ;;  %3790 = vmatprep.subr.bf16.mxu1 %v4086_v57 }
 0x7a2   : > { %3812 = vmatprep.subr.bf16.mxu0 %v4087_v58 }
 0x7a4   : > { %3791 = vmatpush3.bf16.msra.mxu1 %v4088_v59 }
 0x7a5   : > { %3813 = vmatpush3.bf16.msra.mxu0 %v4089_v60  ;;  %3792 = vmatprep.subr.bf16.mxu1 %v4090_v61 }
 0x7a6   : > { %3814 = vmatprep.subr.bf16.mxu0 %v4091_v62 }
 0x7a8   : > { %3793 = vmatpush3.bf16.msra.mxu1 %v4092_v3 }
 0x7a9   : > { %3815 = vmatpush3.bf16.msra.mxu0 %v4093_v4  ;;  %3794 = vmatprep.subr.bf16.mxu1 %v4094_v9 }
 0x7aa   : > { %3816 = vmatprep.subr.bf16.mxu0 %v4095_v10 }
 0x7ac   : > { %3795 = vmatpush3.bf16.msra.mxu1 %v4096_v13 }
 0x7ad   : > { %3817 = vmatpush3.bf16.msra.mxu0 %v4097_v6  ;;  %3796 = vmatprep.subr.bf16.mxu1 %v4098_v14 }
 0x7ae   : > { %3818 = vmatprep.subr.bf16.mxu0 %v4099_v15 }
 0x7b0   : > { %3797 = vmatpush3.bf16.msra.mxu1 %v4100_v16 }
 0x7b1   : > { %3819 = vmatpush3.bf16.msra.mxu0 %v4101_v17  ;;  %3798 = vmatprep.subr.bf16.mxu1 %v4102_v18 }
 0x7b2   : > { %3820 = vmatprep.subr.bf16.mxu0 %v4103_v19 }
 0x7b4   : > { %3799 = vmatpush3.bf16.msra.mxu1 %v4104_v20 }
 0x7b5   : > { %3821 = vmatpush3.bf16.msra.mxu0 %v4105_v25 }
 0x7b7   : > { %3234 = vmatmul.mubr.bf16.vlgmr.msra.gmra.mrb[48].mxu1 %v1926_v27  ;;  %v3618_v27 = vld [vmem:[%s5160_s14] ss:$0 sm:$0xff] }
 0x7b8   : > { %3274 = vmatmul.mubr.bf16.vlgmr.msra.gmra.mrb[52].mxu0 %v1928_v28 }
 0x82a   : > { %v3668_v29 = vpop.f32.mrb[36].mxu1  ;;  %v3690_v24 = vpop.f32.mrb[40].mxu0 }
 0x82b   : > { %v3669_v31 = vpop.f32.mrb[37].mxu1  ;;  %v3691_v32 = vpop.f32.mrb[41].mxu0 }
 0x82c   : > { %v3670_v36 = vadd.f32 %v3669_v31, %v3668_v29  ;;  %v3692_v37 = vadd.f32 %v3691_v32, %v3690_v24  ;;  %v3671_v38 = vpop.f32.mrb[38].mxu1  ;;  %v3693_v39 = vpop.f32.mrb[42].mxu0  ;;  %v3619_v29 = vld [vmem:[%s5161_s15] ss:$0 sm:$0xff] }
 0x82d   : > { %v3672_v33 = vpop.f32.mrb[39].mxu1  ;;  %v3694_v42 = vpop.f32.mrb[43].mxu0 }
 0x82e   : > { %v2996_v2 = vadd.f32 %v3670_v36, %v3489_v30 }
 0x830   : > { %v3036_v43 = vadd.f32 %v3692_v37, %v2996_v2 }
 0x84a   : > { %v3712_v44 = vpop.f32.mrb[40].mxu1  ;;  %v3734_v1 = vpop.f32.mrb[44].mxu0 }
 0x84b   : > { %v3713_v0 = vpop.f32.mrb[41].mxu1  ;;  %v3735_v22 = vpop.f32.mrb[45].mxu0 }
 0x84c   : > { %v3714_v23 = vadd.f32 %v3713_v0, %v3712_v44  ;;  %v3736_v45 = vadd.f32 %v3735_v22, %v3734_v1  ;;  %v3715_v46 = vpop.f32.mrb[42].mxu1  ;;  %v3737_v47 = vpop.f32.mrb[46].mxu0 }
 0x84d   : > { %v3716_v34 = vpop.f32.mrb[43].mxu1  ;;  %v3738_v35 = vpop.f32.mrb[47].mxu0 }
 0x84e   : > { %v3076_v63 = vadd.f32 %v3714_v23, %v3036_v43 }
 0x850   : > { %v3116_v5 = vadd.f32 %v3736_v45, %v3076_v63 }
 0x86a   : > { %v3756_v11 = vpop.f32.mrb[44].mxu1 }
 0x86b   : > { %v3778_v48 = vpop.f32.mrb[48].mxu0  ;;  %v3757_v49 = vpop.f32.mrb[45].mxu1 }
 0x86c   : > { %v3758_v12 = vadd.f32 %v3757_v49, %v3756_v11  ;;  %v3779_v50 = vpop.f32.mrb[49].mxu0  ;;  %v3759_v7 = vpop.f32.mrb[46].mxu1 }
 0x86d   : > { %v3780_v8 = vadd.f32 %v3779_v50, %v3778_v48  ;;  %v3781_v51 = vpop.f32.mrb[50].mxu0  ;;  %v3760_v52 = vpop.f32.mrb[47].mxu1 }
 0x86e   : > { %v3156_v40 = vadd.f32 %v3758_v12, %v3116_v5  ;;  %v3782_v41 = vpop.f32.mrb[51].mxu0 }
 0x870   : > { %v3196_v54 = vadd.f32 %v3780_v8, %v3156_v40 }
 0x88a   : > { %v3800_v55 = vpop.f32.mrb[48].mxu1 }
 0x88b   : > { %v3822_v56 = vpop.f32.mrb[52].mxu0  ;;  %v3801_v57 = vpop.f32.mrb[49].mxu1 }
 0x88c   : > { %v3802_v58 = vadd.f32 %v3801_v57, %v3800_v55  ;;  %v3823_v59 = vpop.f32.mrb[53].mxu0  ;;  %v3803_v60 = vpop.f32.mrb[50].mxu1 }
 0x88d   : > { %v3824_v61 = vadd.f32 %v3823_v59, %v3822_v56  ;;  %v3825_v62 = vpop.f32.mrb[54].mxu0  ;;  %v3804_v3 = vpop.f32.mrb[51].mxu1 }
 0x88e   : > { %v3236_v4 = vadd.f32 %v3802_v58, %v3196_v54  ;;  %v3826_v9 = vpop.f32.mrb[55].mxu0 }
 0x890   : > { %v3276_v10 = vadd.f32 %v3824_v61, %v3236_v4 }
 0x892   : > { %v3281_v13 = vadd.f32 %v3276_v10, %v4538_v53 }
 0x894   : > { %v3284_v6 = vsel %vm588_vm1, %v3281_v13, 0.0  ;;  %v3288_v14 = vmul.f32 %v3281_v13, %v3281_v13 }
 0x895   : > { %3285 = vadd.xlane.f32.xlu0 %v3284_v6 }
 0x896   : > { %v3289_v15 = vsel %vm588_vm1, %v3288_v14, 0.0 }
 0x897   : > { %3290 = vadd.xlane.f32.xlu1 %v3289_v15 }
 0x922   : > { %v3286_v16 = vpop.xlane.xlu0 %3285 }
 0x923   : > { %v3287_v17 = vmul.f32 0.03125, %v3286_v16 }
 0x924   : > { %v3291_v18 = vpop.xlane.xlu1 %3290 }
 0x925   : > { %v3293_v19 = vmul.f32 %v3287_v17, %v3287_v17  ;;  %v3292_v20 = vmul.f32 0.03125, %v3291_v18  ;;  %v3297_v26 = vsub.f32 %v3281_v13, %v3287_v17 }
 0x927   : > { %v3294_v21 = vsub.f32 %v3292_v20, %v3293_v19 }
 0x929   : > { %v3295_v25 = vadd.f32 1e-05, %v3294_v21 }
 0x92b   : > { %4124 = vrsqrt.f32 %v3295_v25 }
 0x935   : > { %v4125_v53 = vpop.eup %4124 }
 0x936   : > { %v3298_v28 = vmul.f32 %v4125_v53, %v3297_v26 }
 0x938   : > { %v3305_v24 = vmul.f32 %v3618_v27, %v3298_v28 }
 0x93a   : > { %v3312_v30 = vadd.f32 %v3619_v29, %v3305_v24 }
 0x93c   : > { %3313 = vst.msk [vmem:[%s547_s17] sm:$0xff] %vm588_vm1, %v3312_v30 }
 0x93d   : > { %4139 = shalt.err (!%p4136_p5)
}
 0x93e   : > { %s4140_s23 = scalar_lea.hbm %s5098_s21, 128  ;;  %s4144_s17 = scalar_lea.hbm %s5162_s16, 256 }
 0x93f   : > { %p4141_p6 = scmp.ne.s32.totalorder %s5098_s21, %s4140_s23  ;;  %p4145_p10 = scmp.lt.u32.totalorder %s5098_s21, %s5162_s16 }
 0x940   : > { %p4146_p11 = scmp.lt.u32.totalorder %s4144_s17, %s4140_s23  ;;  %p4148_p13 = scmp.lt.u32.totalorder %s4140_s23, %s5098_s21 }
 0x941   : > { %p4142_p7 = pnand %p4141_p6, %p4345_p4 }
 0x942   : > { %p4147_p12 = por %p4146_p11, %p4145_p10 }
 0x943   : > { %p4143_p9 = pneg %p4142_p7 }
 0x944   : > { %p4149_p0 = por %p4148_p13, %p4147_p12 }
 0x946   : > { %p4150_p1 = pnand %p4149_p0, %p4143_p9 }
 0x948   : > { %4153 = shalt.err (!%p4150_p1)
}
 0x949   : > { %3900 = dma.vmem_to_hbm [thread:$0]  (%p4345_p4), %s5100_s30, 128, %s5098_s21, %s3315_s29  }
 0x94a PF: > { %s5180_s18 = sld [smem:[#allocation7_spill]]  ;;  %p3906_p2 = scmp.ge.s32.totalorder %s4204_s26, 2 }
 0x94c   : > { %p3903_p3 = pnand %p3906_p2, %p4352_p8 }
 0x950   : > { %s3341_s25 = sand.u32 1, %s5180_s18  }
 0x951   : > { %s3342_s19 = scalar_lea.sflag [#allocation5], %s3341_s25 }
 0x952   : > { %4179 = dma.done.wait (!%p3903_p3), %s3342_s19, 128  }
 0x953   : > { %4181 = vsyncadd (!%p3903_p3), %s3342_s19, 4294967168  ;;  %s29_s26 = sadd.s32 1, %s4204_s26   ;;  %s5182_s23 = sld [smem:[#allocation8_spill]] }
 0x954   : > { %p26_p5 = scmp.ge.s32.totalorder %s29_s26, 4   ;;  %s5183_s0 = sld [smem:[#allocation12_spill]] }
 0x955   : > { %s5184_s24 = sld [smem:[#allocation9_spill]]  ;;  %s5185_s25 = sld [smem:[#allocation10_spill]] }
 0x956   : > { %s5186_s21 = smov %s4188_s22  ;;  %28 = sbr.rel (!%p26_p5) target bundleno = 7 (0x7), region = 126 }
 0x959   : > { %s5187_s22 = smov %s5182_s23 }
 0x95a   : > { %s5188_s23 = smov %s5183_s0 }
 0x95d   :  { %3347 = vsyncpa [#allocation5], 1 }
 0x95e   :  { %3349 = vsyncpa [#allocation5 + $0x1], 1 }

</bundles_post_ra>
